<compile_context>
chip_gen: v6e
topology: v6e:2x2x1
jax: 0.10.0
libtpu: 0.0.40
codegen_flags: <defaults>
</compile_context>

<pallas_src>
import jax
import jax.numpy as jnp
from jax.experimental import pallas as pl
from jax.experimental.pallas import tpu as pltpu

# ------------------------- small roberta-like config -------------------------
B, S, H = 2, 8, 32          # batch, seq, hidden
NH, HD = 4, 8               # heads, head dim (NH*HD == H)
FFN = 64                    # intermediate size
LAYERS = 2                  # encoder layers
VOCAB = 50
TYPE_VOCAB = 2
PAD_IDX = 1                 # RoBERTa padding_idx
MAX_POS = S + 2             # position ids run up to S + padding_idx
PRE_CLS = 100               # pre_classifier out dim (as in the torch module)
NUM_CLASSES = 3
PRE_PAD = 128               # lane-dense padding of PRE_CLS
CLS_PAD = 128               # lane-dense padding of NUM_CLASSES
BS = B * S
G = NH * B                  # (head, batch) groups for batched attention
EPS = 1e-5


# ------------------------------ kernel helpers -------------------------------
def _layernorm(x, gamma, beta, eps=EPS):
    mu = jnp.mean(x, axis=-1, keepdims=True)
    var = jnp.mean((x - mu) ** 2, axis=-1, keepdims=True)
    return (x - mu) * jax.lax.rsqrt(var + eps) * gamma + beta


def _split_heads(t):
    # [B*S, H] -> [NH*B, S, HD]   (group index g = h*B + b)
    parts = []
    for h in range(NH):
        for b in range(B):
            parts.append(t[b * S:(b + 1) * S, h * HD:(h + 1) * HD][None])
    return jnp.concatenate(parts, axis=0)


def _merge_heads(t):
    # [NH*B, S, HD] -> [B*S, H]
    rows = []
    for b in range(B):
        rows.append(jnp.concatenate([t[h * B + b] for h in range(NH)], axis=-1))
    return jnp.concatenate(rows, axis=0)


# ------------------------------- fused kernel --------------------------------
def fused_roberta_kernel(x0_ref, amask_ref, emb_ln_ref,
                         w_qkv_ref, b_qkv_ref, w_o_ref, w_i_ref, b_ffn_ref,
                         w_out_ref, vec_h_ref,
                         pre_w_ref, pre_b_ref, cls_w_ref, cls_b_ref,
                         o_ref):
    f32 = jnp.float32
    scale = 1.0 / (HD ** 0.5)

    x = x0_ref[...].astype(f32)                                 # [B*S, H]
    x = _layernorm(x, emb_ln_ref[0:1, :], emb_ln_ref[1:2, :])   # embedding LayerNorm
    amask = amask_ref[...]                                      # [G, 1, S] additive mask

    for l in range(LAYERS):                                     # tiny static unroll
        vh = vec_h_ref[l]                                       # [6, H] packed vectors
        b_o, ln1_g, ln1_b = vh[0:1], vh[1:2], vh[2:3]
        b_out, ln2_g, ln2_b = vh[3:4], vh[4:5], vh[5:6]

        # fused QKV projection: one [BS,H] @ [H,3H] MXU push
        qkv = jnp.dot(x, w_qkv_ref[l], preferred_element_type=f32) + b_qkv_ref[l]
        q_g = _split_heads(qkv[:, 0:H])
        k_g = _split_heads(qkv[:, H:2 * H])
        v_g = _split_heads(qkv[:, 2 * H:3 * H])

        # batched multi-head attention, single softmax over all (head, batch) groups
        s = jnp.einsum('gqd,gkd->gqk', q_g, k_g,
                       preferred_element_type=f32) * scale + amask
        s = s - jnp.max(s, axis=-1, keepdims=True)
        p = jnp.exp(s)
        p = p * pl.reciprocal(jnp.sum(p, axis=-1, keepdims=True), approx=True)
        ctx = _merge_heads(jnp.einsum('gqk,gkd->gqd', p, v_g,
                                      preferred_element_type=f32))

        attn = jnp.dot(ctx, w_o_ref[l], preferred_element_type=f32) + b_o
        y = _layernorm(x + attn, ln1_g, ln1_b)

        h1 = jnp.dot(y, w_i_ref[l], preferred_element_type=f32) + b_ffn_ref[l]
        # TODO(synk): HF RoBERTa uses exact (erf) GELU; tanh approximation for portability.
        h1 = jax.nn.gelu(h1, approximate=True)
        h2 = jnp.dot(h1, w_out_ref[l], preferred_element_type=f32) + b_out
        x = _layernorm(y + h2, ln2_g, ln2_b)

    # classification head applied to all tokens (lane-dense [BS, 128] output slab);
    # the [CLS] rows (b*S) and the first NUM_CLASSES columns are selected in JAX.
    hh = jnp.dot(x, pre_w_ref[...], preferred_element_type=f32) + pre_b_ref[...]
    hh = jnp.maximum(hh, 0.0)                                   # ReLU
    # Dropout(p=0.3): inference mode -> identity.
    o_ref[...] = jnp.dot(hh, cls_w_ref[...], preferred_element_type=f32) + cls_b_ref[...]


# ---------------------------- pallas_call wrapper -----------------------------
def _full_spec(shape):
    nd = len(shape)
    return pl.BlockSpec(shape, lambda *args, _nd=nd: (0,) * _nd)


def run_fused(x0, amask_g, p):
    args = (x0, amask_g, p['emb_ln'], p['w_qkv'], p['b_qkv'], p['w_o'],
            p['w_i'], p['b_ffn'], p['w_out'], p['vec_h'],
            p['pre_w'], p['pre_b'], p['cls_w'], p['cls_b'])
    return pl.pallas_call(
        fused_roberta_kernel,
        out_shape=jax.ShapeDtypeStruct((BS, CLS_PAD), jnp.float32),
        grid=(1,),
        in_specs=[_full_spec(a.shape) for a in args],
        out_specs=_full_spec((BS, CLS_PAD)),
        compiler_params=pltpu.CompilerParams(dimension_semantics=("arbitrary",)),
    )(*args)


# ------------------------------- parameters ----------------------------------
def init_params(key):
    keys = iter(jax.random.split(key, 16))

    def w(shape):
        return jax.random.normal(next(keys), shape, jnp.float32) * 0.02

    ones = lambda: jnp.ones((LAYERS, 1, H), jnp.float32)
    zeros = lambda: jnp.zeros((LAYERS, 1, H), jnp.float32)

    p = {
        'word_emb': w((VOCAB, H)),
        'pos_emb': w((MAX_POS, H)),
        'type_emb': w((TYPE_VOCAB, H)),
        # [2, H]: row 0 = gamma, row 1 = beta
        'emb_ln': jnp.concatenate([jnp.ones((1, H), jnp.float32),
                                   jnp.zeros((1, H), jnp.float32)], axis=0),
        # per-layer weights stacked along a leading LAYERS axis
        'w_qkv': w((LAYERS, H, 3 * H)),
        'b_qkv': jnp.zeros((LAYERS, 1, 3 * H), jnp.float32),
        'w_o': w((LAYERS, H, H)),
        'w_i': w((LAYERS, H, FFN)),
        'b_ffn': jnp.zeros((LAYERS, 1, FFN), jnp.float32),
        'w_out': w((LAYERS, FFN, H)),
        # packed H-length vectors; rows: b_o, ln1_g, ln1_b, b_out, ln2_g, ln2_b
        'vec_h': jnp.concatenate([zeros(), ones(), zeros(),
                                  zeros(), ones(), zeros()], axis=1),
        # lane-dense padded head weights (zero-padded; padding contributes nothing)
        'pre_w': jnp.zeros((H, PRE_PAD), jnp.float32).at[:, :PRE_CLS].set(w((H, PRE_CLS))),
        'pre_b': jnp.zeros((1, PRE_PAD), jnp.float32),
        'cls_w': jnp.zeros((PRE_PAD, CLS_PAD), jnp.float32).at[:PRE_CLS, :NUM_CLASSES].set(
            w((PRE_CLS, NUM_CLASSES))),
        'cls_b': jnp.zeros((1, CLS_PAD), jnp.float32),
    }
    return p


# --------------------------------- forward -----------------------------------
def roberta_class_forward(params, input_ids, attention_mask, token_type_ids):
    # --- embeddings (gathers are plain-JAX glue) ---
    we = jnp.take(params['word_emb'], input_ids, axis=0)                 # [B, S, H]
    # HF RoBERTa position ids: cumsum(mask) * mask + padding_idx
    mask = attention_mask.astype(jnp.int32)
    pos_ids = jnp.cumsum(mask, axis=1) * mask + PAD_IDX                  # [B, S]
    pe = jnp.take(params['pos_emb'], pos_ids, axis=0)                    # [B, S, H]
    te = jnp.take(params['type_emb'], token_type_ids, axis=0)            # [B, S, H]
    x0 = (we + pe + te).astype(jnp.float32).reshape(BS, H)

    # additive attention mask, pre-tiled per (head, batch) group: [NH*B, 1, S]
    amask = (1.0 - attention_mask.astype(jnp.float32)) * -1e9            # [B, S]
    amask_g = jnp.broadcast_to(amask[None, :, None, :], (NH, B, 1, S)).reshape(G, 1, S)

    out = run_fused(x0, amask_g, params)                                 # [B*S, CLS_PAD]
    # pooler = hidden_state[:, 0]  -> head already applied inside the kernel
    logits = out.reshape(B, S, CLS_PAD)[:, 0, :NUM_CLASSES]              # [B, 3]
    return logits


# ----------------------------------- main -------------------------------------
if __name__ == "__main__":
    key = jax.random.PRNGKey(0)
    k_param, k_ids = jax.random.split(key)

    params = init_params(k_param)

    input_ids = jax.random.randint(k_ids, (B, S), 0, VOCAB, dtype=jnp.int32)
    attention_mask = jnp.ones((B, S), jnp.int32).at[1, S - 2:].set(0)    # pad tail of seq 1
    token_type_ids = jnp.zeros((B, S), jnp.int32)

    forward = jax.jit(roberta_class_forward)
    logits = forward(params, input_ids, attention_mask, token_type_ids)
    logits = jax.block_until_ready(logits)

    assert logits.shape == (B, NUM_CLASSES) and logits.dtype == jnp.float32
    assert bool(jnp.all(jnp.isfinite(logits)))
    print("KERNEL_OK")
</pallas_src>

<mosaic_0001>
module attributes {stable_mosaic.version = 11 : i64} {
  func.func @fused_roberta_kernel(%arg0: i32, %arg1: memref<16x32xf32, #tpu.memory_space<vmem>>, %arg2: memref<8x1x8xf32, #tpu.memory_space<vmem>>, %arg3: memref<2x32xf32, #tpu.memory_space<vmem>>, %arg4: memref<2x32x96xf32, #tpu.memory_space<vmem>>, %arg5: memref<2x1x96xf32, #tpu.memory_space<vmem>>, %arg6: memref<2x32x32xf32, #tpu.memory_space<vmem>>, %arg7: memref<2x32x64xf32, #tpu.memory_space<vmem>>, %arg8: memref<2x1x64xf32, #tpu.memory_space<vmem>>, %arg9: memref<2x64x32xf32, #tpu.memory_space<vmem>>, %arg10: memref<2x6x32xf32, #tpu.memory_space<vmem>>, %arg11: memref<32x128xf32, #tpu.memory_space<vmem>>, %arg12: memref<1x128xf32, #tpu.memory_space<vmem>>, %arg13: memref<128x128xf32, #tpu.memory_space<vmem>>, %arg14: memref<1x128xf32, #tpu.memory_space<vmem>>, %arg15: memref<16x128xf32, #tpu.memory_space<vmem>>) attributes {dimension_semantics = [#tpu.dimension_semantics<arbitrary>], iteration_bounds = array<i64: 1>, scalar_prefetch = 0 : i64, scratch_operands = 0 : i64, tpu.core_type = #tpu.core_type<tc>, window_params = [{pipeline_mode = #tpu.pipeline_mode<synchronous>, transform_indices = @transform_0, window_bounds = array<i64: 16, 32>}, {pipeline_mode = #tpu.pipeline_mode<synchronous>, transform_indices = @transform_1, window_bounds = array<i64: 8, 1, 8>}, {pipeline_mode = #tpu.pipeline_mode<synchronous>, transform_indices = @transform_2, window_bounds = array<i64: 2, 32>}, {pipeline_mode = #tpu.pipeline_mode<synchronous>, transform_indices = @transform_3, window_bounds = array<i64: 2, 32, 96>}, {pipeline_mode = #tpu.pipeline_mode<synchronous>, transform_indices = @transform_4, window_bounds = array<i64: 2, 1, 96>}, {pipeline_mode = #tpu.pipeline_mode<synchronous>, transform_indices = @transform_5, window_bounds = array<i64: 2, 32, 32>}, {pipeline_mode = #tpu.pipeline_mode<synchronous>, transform_indices = @transform_6, window_bounds = array<i64: 2, 32, 64>}, {pipeline_mode = #tpu.pipeline_mode<synchronous>, transform_indices = @transform_7, window_bounds = array<i64: 2, 1, 64>}, {pipeline_mode = #tpu.pipeline_mode<synchronous>, transform_indices = @transform_8, window_bounds = array<i64: 2, 64, 32>}, {pipeline_mode = #tpu.pipeline_mode<synchronous>, transform_indices = @transform_9, window_bounds = array<i64: 2, 6, 32>}, {pipeline_mode = #tpu.pipeline_mode<synchronous>, transform_indices = @transform_10, window_bounds = array<i64: 32, 128>}, {pipeline_mode = #tpu.pipeline_mode<synchronous>, transform_indices = @transform_11, window_bounds = array<i64: 1, 128>}, {pipeline_mode = #tpu.pipeline_mode<synchronous>, transform_indices = @transform_12, window_bounds = array<i64: 128, 128>}, {pipeline_mode = #tpu.pipeline_mode<synchronous>, transform_indices = @transform_13, window_bounds = array<i64: 1, 128>}, {pipeline_mode = #tpu.pipeline_mode<synchronous>, transform_indices = @transform_14, window_bounds = array<i64: 16, 128>}]} {
    %c0 = arith.constant 0 : index
    %c0_0 = arith.constant 0 : index
    %0 = vector.load %arg1[%c0, %c0_0] : memref<16x32xf32, #tpu.memory_space<vmem>>, vector<16x32xf32>
    %c0_1 = arith.constant 0 : index
    %c0_2 = arith.constant 0 : index
    %1 = vector.load %arg3[%c0_1, %c0_2] : memref<2x32xf32, #tpu.memory_space<vmem>>, vector<1x32xf32>
    %c1 = arith.constant 1 : index
    %c0_3 = arith.constant 0 : index
    %2 = vector.load %arg3[%c1, %c0_3] : memref<2x32xf32, #tpu.memory_space<vmem>>, vector<1x32xf32>
    %cst = arith.constant dense<0.000000e+00> : vector<16xf32>
    %3 = vector.multi_reduction <add>, %0, %cst [1] : vector<16x32xf32> to vector<16xf32>
    %4 = vector.shape_cast %3 : vector<16xf32> to vector<16x1xf32>
    %cst_4 = arith.constant 3.200000e+01 : f32
    %5 = vector.broadcast %cst_4 : f32 to vector<16x1xf32>
    %6 = arith.divf %4, %5 : vector<16x1xf32>
    %7 = vector.broadcast %6 : vector<16x1xf32> to vector<16x32xf32>
    %8 = arith.subf %0, %7 : vector<16x32xf32>
    %9 = arith.mulf %8, %8 : vector<16x32xf32>
    %cst_5 = arith.constant dense<0.000000e+00> : vector<16xf32>
    %10 = vector.multi_reduction <add>, %9, %cst_5 [1] : vector<16x32xf32> to vector<16xf32>
    %11 = vector.shape_cast %10 : vector<16xf32> to vector<16x1xf32>
    %cst_6 = arith.constant 3.200000e+01 : f32
    %12 = vector.broadcast %cst_6 : f32 to vector<16x1xf32>
    %13 = arith.divf %11, %12 : vector<16x1xf32>
    %14 = vector.broadcast %6 : vector<16x1xf32> to vector<16x32xf32>
    %15 = arith.subf %0, %14 : vector<16x32xf32>
    %cst_7 = arith.constant 9.99999974E-6 : f32
    %16 = vector.broadcast %cst_7 : f32 to vector<16x1xf32>
    %17 = arith.addf %13, %16 : vector<16x1xf32>
    %18 = math.rsqrt %17 : vector<16x1xf32>
    %19 = vector.broadcast %18 : vector<16x1xf32> to vector<16x32xf32>
    %20 = arith.mulf %15, %19 : vector<16x32xf32>
    %21 = vector.broadcast %1 : vector<1x32xf32> to vector<16x32xf32>
    %22 = arith.mulf %20, %21 : vector<16x32xf32>
    %23 = vector.broadcast %2 : vector<1x32xf32> to vector<16x32xf32>
    %24 = arith.addf %22, %23 : vector<16x32xf32>
    %c0_8 = arith.constant 0 : index
    %c0_9 = arith.constant 0 : index
    %c0_10 = arith.constant 0 : index
    %25 = vector.load %arg2[%c0_8, %c0_9, %c0_10] : memref<8x1x8xf32, #tpu.memory_space<vmem>>, vector<8x1x8xf32>
    %c0_11 = arith.constant 0 : index
    %c0_12 = arith.constant 0 : index
    %c0_13 = arith.constant 0 : index
    %26 = vector.load %arg10[%c0_11, %c0_12, %c0_13] : memref<2x6x32xf32, #tpu.memory_space<vmem>>, vector<1x6x32xf32>
    %27 = vector.shape_cast %26 : vector<1x6x32xf32> to vector<6x32xf32>
    %28 = vector.extract_strided_slice %27 {offsets = [0, 0], sizes = [1, 32], strides = [1, 1]} : vector<6x32xf32> to vector<1x32xf32>
    %29 = vector.extract_strided_slice %27 {offsets = [1, 0], sizes = [1, 32], strides = [1, 1]} : vector<6x32xf32> to vector<1x32xf32>
    %30 = vector.extract_strided_slice %27 {offsets = [2, 0], sizes = [1, 32], strides = [1, 1]} : vector<6x32xf32> to vector<1x32xf32>
    %31 = vector.extract_strided_slice %27 {offsets = [3, 0], sizes = [1, 32], strides = [1, 1]} : vector<6x32xf32> to vector<1x32xf32>
    %32 = vector.extract_strided_slice %27 {offsets = [4, 0], sizes = [1, 32], strides = [1, 1]} : vector<6x32xf32> to vector<1x32xf32>
    %33 = vector.extract_strided_slice %27 {offsets = [5, 0], sizes = [1, 32], strides = [1, 1]} : vector<6x32xf32> to vector<1x32xf32>
    %c0_14 = arith.constant 0 : index
    %c0_15 = arith.constant 0 : index
    %c0_16 = arith.constant 0 : index
    %34 = vector.load %arg4[%c0_14, %c0_15, %c0_16] : memref<2x32x96xf32, #tpu.memory_space<vmem>>, vector<1x32x96xf32>
    %35 = vector.shape_cast %34 : vector<1x32x96xf32> to vector<32x96xf32>
    %cst_17 = arith.constant dense<0.000000e+00> : vector<16x96xf32>
    %36 = tpu.matmul %24, %35, %cst_17 {dimension_numbers = #tpu.dot_dimension_numbers<[1], [0], [0], [1], [0, 0, 1, 1], [], []>} : vector<16x32xf32>, vector<32x96xf32>, vector<16x96xf32> -> vector<16x96xf32>
    %c0_18 = arith.constant 0 : index
    %c0_19 = arith.constant 0 : index
    %c0_20 = arith.constant 0 : index
    %37 = vector.load %arg5[%c0_18, %c0_19, %c0_20] : memref<2x1x96xf32, #tpu.memory_space<vmem>>, vector<1x1x96xf32>
    %38 = vector.shape_cast %37 : vector<1x1x96xf32> to vector<1x96xf32>
    %39 = vector.broadcast %38 : vector<1x96xf32> to vector<16x96xf32>
    %40 = arith.addf %36, %39 : vector<16x96xf32>
    %41 = vector.extract_strided_slice %40 {offsets = [0, 0], sizes = [16, 32], strides = [1, 1]} : vector<16x96xf32> to vector<16x32xf32>
    %42 = vector.extract_strided_slice %41 {offsets = [0, 0], sizes = [8, 8], strides = [1, 1]} : vector<16x32xf32> to vector<8x8xf32>
    %43 = vector.shape_cast %42 : vector<8x8xf32> to vector<1x8x8xf32>
    %44 = vector.extract_strided_slice %41 {offsets = [8, 0], sizes = [8, 8], strides = [1, 1]} : vector<16x32xf32> to vector<8x8xf32>
    %45 = vector.shape_cast %44 : vector<8x8xf32> to vector<1x8x8xf32>
    %46 = vector.extract_strided_slice %41 {offsets = [0, 8], sizes = [8, 8], strides = [1, 1]} : vector<16x32xf32> to vector<8x8xf32>
    %47 = vector.shape_cast %46 : vector<8x8xf32> to vector<1x8x8xf32>
    %48 = vector.extract_strided_slice %41 {offsets = [8, 8], sizes = [8, 8], strides = [1, 1]} : vector<16x32xf32> to vector<8x8xf32>
    %49 = vector.shape_cast %48 : vector<8x8xf32> to vector<1x8x8xf32>
    %50 = vector.extract_strided_slice %41 {offsets = [0, 16], sizes = [8, 8], strides = [1, 1]} : vector<16x32xf32> to vector<8x8xf32>
    %51 = vector.shape_cast %50 : vector<8x8xf32> to vector<1x8x8xf32>
    %52 = vector.extract_strided_slice %41 {offsets = [8, 16], sizes = [8, 8], strides = [1, 1]} : vector<16x32xf32> to vector<8x8xf32>
    %53 = vector.shape_cast %52 : vector<8x8xf32> to vector<1x8x8xf32>
    %54 = vector.extract_strided_slice %41 {offsets = [0, 24], sizes = [8, 8], strides = [1, 1]} : vector<16x32xf32> to vector<8x8xf32>
    %55 = vector.shape_cast %54 : vector<8x8xf32> to vector<1x8x8xf32>
    %56 = vector.extract_strided_slice %41 {offsets = [8, 24], sizes = [8, 8], strides = [1, 1]} : vector<16x32xf32> to vector<8x8xf32>
    %57 = vector.shape_cast %56 : vector<8x8xf32> to vector<1x8x8xf32>
    %58 = tpu.concatenate %43, %45, %47, %49, %51, %53, %55, %57 in 0 : vector<1x8x8xf32>, vector<1x8x8xf32>, vector<1x8x8xf32>, vector<1x8x8xf32>, vector<1x8x8xf32>, vector<1x8x8xf32>, vector<1x8x8xf32>, vector<1x8x8xf32> -> vector<8x8x8xf32>
    %59 = vector.extract_strided_slice %40 {offsets = [0, 32], sizes = [16, 32], strides = [1, 1]} : vector<16x96xf32> to vector<16x32xf32>
    %60 = vector.extract_strided_slice %59 {offsets = [0, 0], sizes = [8, 8], strides = [1, 1]} : vector<16x32xf32> to vector<8x8xf32>
    %61 = vector.shape_cast %60 : vector<8x8xf32> to vector<1x8x8xf32>
    %62 = vector.extract_strided_slice %59 {offsets = [8, 0], sizes = [8, 8], strides = [1, 1]} : vector<16x32xf32> to vector<8x8xf32>
    %63 = vector.shape_cast %62 : vector<8x8xf32> to vector<1x8x8xf32>
    %64 = vector.extract_strided_slice %59 {offsets = [0, 8], sizes = [8, 8], strides = [1, 1]} : vector<16x32xf32> to vector<8x8xf32>
    %65 = vector.shape_cast %64 : vector<8x8xf32> to vector<1x8x8xf32>
    %66 = vector.extract_strided_slice %59 {offsets = [8, 8], sizes = [8, 8], strides = [1, 1]} : vector<16x32xf32> to vector<8x8xf32>
    %67 = vector.shape_cast %66 : vector<8x8xf32> to vector<1x8x8xf32>
    %68 = vector.extract_strided_slice %59 {offsets = [0, 16], sizes = [8, 8], strides = [1, 1]} : vector<16x32xf32> to vector<8x8xf32>
    %69 = vector.shape_cast %68 : vector<8x8xf32> to vector<1x8x8xf32>
    %70 = vector.extract_strided_slice %59 {offsets = [8, 16], sizes = [8, 8], strides = [1, 1]} : vector<16x32xf32> to vector<8x8xf32>
    %71 = vector.shape_cast %70 : vector<8x8xf32> to vector<1x8x8xf32>
    %72 = vector.extract_strided_slice %59 {offsets = [0, 24], sizes = [8, 8], strides = [1, 1]} : vector<16x32xf32> to vector<8x8xf32>
    %73 = vector.shape_cast %72 : vector<8x8xf32> to vector<1x8x8xf32>
    %74 = vector.extract_strided_slice %59 {offsets = [8, 24], sizes = [8, 8], strides = [1, 1]} : vector<16x32xf32> to vector<8x8xf32>
    %75 = vector.shape_cast %74 : vector<8x8xf32> to vector<1x8x8xf32>
    %76 = tpu.concatenate %61, %63, %65, %67, %69, %71, %73, %75 in 0 : vector<1x8x8xf32>, vector<1x8x8xf32>, vector<1x8x8xf32>, vector<1x8x8xf32>, vector<1x8x8xf32>, vector<1x8x8xf32>, vector<1x8x8xf32>, vector<1x8x8xf32> -> vector<8x8x8xf32>
    %77 = vector.extract_strided_slice %40 {offsets = [0, 64], sizes = [16, 32], strides = [1, 1]} : vector<16x96xf32> to vector<16x32xf32>
    %78 = vector.extract_strided_slice %77 {offsets = [0, 0], sizes = [8, 8], strides = [1, 1]} : vector<16x32xf32> to vector<8x8xf32>
    %79 = vector.shape_cast %78 : vector<8x8xf32> to vector<1x8x8xf32>
    %80 = vector.extract_strided_slice %77 {offsets = [8, 0], sizes = [8, 8], strides = [1, 1]} : vector<16x32xf32> to vector<8x8xf32>
    %81 = vector.shape_cast %80 : vector<8x8xf32> to vector<1x8x8xf32>
    %82 = vector.extract_strided_slice %77 {offsets = [0, 8], sizes = [8, 8], strides = [1, 1]} : vector<16x32xf32> to vector<8x8xf32>
    %83 = vector.shape_cast %82 : vector<8x8xf32> to vector<1x8x8xf32>
    %84 = vector.extract_strided_slice %77 {offsets = [8, 8], sizes = [8, 8], strides = [1, 1]} : vector<16x32xf32> to vector<8x8xf32>
    %85 = vector.shape_cast %84 : vector<8x8xf32> to vector<1x8x8xf32>
    %86 = vector.extract_strided_slice %77 {offsets = [0, 16], sizes = [8, 8], strides = [1, 1]} : vector<16x32xf32> to vector<8x8xf32>
    %87 = vector.shape_cast %86 : vector<8x8xf32> to vector<1x8x8xf32>
    %88 = vector.extract_strided_slice %77 {offsets = [8, 16], sizes = [8, 8], strides = [1, 1]} : vector<16x32xf32> to vector<8x8xf32>
    %89 = vector.shape_cast %88 : vector<8x8xf32> to vector<1x8x8xf32>
    %90 = vector.extract_strided_slice %77 {offsets = [0, 24], sizes = [8, 8], strides = [1, 1]} : vector<16x32xf32> to vector<8x8xf32>
    %91 = vector.shape_cast %90 : vector<8x8xf32> to vector<1x8x8xf32>
    %92 = vector.extract_strided_slice %77 {offsets = [8, 24], sizes = [8, 8], strides = [1, 1]} : vector<16x32xf32> to vector<8x8xf32>
    %93 = vector.shape_cast %92 : vector<8x8xf32> to vector<1x8x8xf32>
    %94 = tpu.concatenate %79, %81, %83, %85, %87, %89, %91, %93 in 0 : vector<1x8x8xf32>, vector<1x8x8xf32>, vector<1x8x8xf32>, vector<1x8x8xf32>, vector<1x8x8xf32>, vector<1x8x8xf32>, vector<1x8x8xf32>, vector<1x8x8xf32> -> vector<8x8x8xf32>
    "tpu.trace_start"() <{level = 10 : i32, message = "gqd,gkd->gqk"}> : () -> ()
    %cst_21 = arith.constant dense<0.000000e+00> : vector<8x8x8xf32>
    %95 = tpu.matmul %58, %76, %cst_21 {dimension_numbers = #tpu.dot_dimension_numbers<[2], [2], [1], [1], [0, 0, 0, 1, 1, 1], [0], [0]>} : vector<8x8x8xf32>, vector<8x8x8xf32>, vector<8x8x8xf32> -> vector<8x8x8xf32>
    "tpu.trace_stop"() : () -> ()
    %cst_22 = arith.constant 0.353553385 : f32
    %96 = vector.broadcast %cst_22 : f32 to vector<8x8x8xf32>
    %97 = arith.mulf %95, %96 : vector<8x8x8xf32>
    %98 = vector.broadcast %25 : vector<8x1x8xf32> to vector<8x8x8xf32>
    %99 = arith.addf %97, %98 : vector<8x8x8xf32>
    %cst_23 = arith.constant dense<0xFF800000> : vector<8x8xf32>
    %100 = vector.multi_reduction <maximumf>, %99, %cst_23 [2] : vector<8x8x8xf32> to vector<8x8xf32>
    %101 = vector.shape_cast %100 : vector<8x8xf32> to vector<8x8x1xf32>
    %102 = vector.broadcast %101 : vector<8x8x1xf32> to vector<8x8x8xf32>
    %103 = arith.subf %99, %102 : vector<8x8x8xf32>
    %104 = math.exp %103 : vector<8x8x8xf32>
    %cst_24 = arith.constant dense<0.000000e+00> : vector<8x8xf32>
    %105 = vector.multi_reduction <add>, %104, %cst_24 [2] : vector<8x8x8xf32> to vector<8x8xf32>
    %106 = vector.shape_cast %105 : vector<8x8xf32> to vector<8x8x1xf32>
    %107 = tpu.reciprocal %106 {approx = true} : vector<8x8x1xf32> -> vector<8x8x1xf32>
    %108 = vector.broadcast %107 : vector<8x8x1xf32> to vector<8x8x8xf32>
    %109 = arith.mulf %104, %108 : vector<8x8x8xf32>
    "tpu.trace_start"() <{level = 10 : i32, message = "gqk,gkd->gqd"}> : () -> ()
    %cst_25 = arith.constant dense<0.000000e+00> : vector<8x8x8xf32>
    %110 = tpu.matmul %109, %94, %cst_25 {dimension_numbers = #tpu.dot_dimension_numbers<[2], [1], [1], [2], [0, 0, 0, 1, 1, 2], [0], [0]>} : vector<8x8x8xf32>, vector<8x8x8xf32>, vector<8x8x8xf32> -> vector<8x8x8xf32>
    "tpu.trace_stop"() : () -> ()
    %111 = vector.extract_strided_slice %110 {offsets = [0, 0, 0], sizes = [1, 8, 8], strides = [1, 1, 1]} : vector<8x8x8xf32> to vector<1x8x8xf32>
    %112 = vector.shape_cast %111 : vector<1x8x8xf32> to vector<8x8xf32>
    %113 = vector.extract_strided_slice %110 {offsets = [2, 0, 0], sizes = [1, 8, 8], strides = [1, 1, 1]} : vector<8x8x8xf32> to vector<1x8x8xf32>
    %114 = vector.shape_cast %113 : vector<1x8x8xf32> to vector<8x8xf32>
    %115 = vector.extract_strided_slice %110 {offsets = [4, 0, 0], sizes = [1, 8, 8], strides = [1, 1, 1]} : vector<8x8x8xf32> to vector<1x8x8xf32>
    %116 = vector.shape_cast %115 : vector<1x8x8xf32> to vector<8x8xf32>
    %117 = vector.extract_strided_slice %110 {offsets = [6, 0, 0], sizes = [1, 8, 8], strides = [1, 1, 1]} : vector<8x8x8xf32> to vector<1x8x8xf32>
    %118 = vector.shape_cast %117 : vector<1x8x8xf32> to vector<8x8xf32>
    %119 = tpu.concatenate %112, %114, %116, %118 in 1 : vector<8x8xf32>, vector<8x8xf32>, vector<8x8xf32>, vector<8x8xf32> -> vector<8x32xf32>
    %120 = vector.extract_strided_slice %110 {offsets = [1, 0, 0], sizes = [1, 8, 8], strides = [1, 1, 1]} : vector<8x8x8xf32> to vector<1x8x8xf32>
    %121 = vector.shape_cast %120 : vector<1x8x8xf32> to vector<8x8xf32>
    %122 = vector.extract_strided_slice %110 {offsets = [3, 0, 0], sizes = [1, 8, 8], strides = [1, 1, 1]} : vector<8x8x8xf32> to vector<1x8x8xf32>
    %123 = vector.shape_cast %122 : vector<1x8x8xf32> to vector<8x8xf32>
    %124 = vector.extract_strided_slice %110 {offsets = [5, 0, 0], sizes = [1, 8, 8], strides = [1, 1, 1]} : vector<8x8x8xf32> to vector<1x8x8xf32>
    %125 = vector.shape_cast %124 : vector<1x8x8xf32> to vector<8x8xf32>
    %126 = vector.extract_strided_slice %110 {offsets = [7, 0, 0], sizes = [1, 8, 8], strides = [1, 1, 1]} : vector<8x8x8xf32> to vector<1x8x8xf32>
    %127 = vector.shape_cast %126 : vector<1x8x8xf32> to vector<8x8xf32>
    %128 = tpu.concatenate %121, %123, %125, %127 in 1 : vector<8x8xf32>, vector<8x8xf32>, vector<8x8xf32>, vector<8x8xf32> -> vector<8x32xf32>
    %129 = tpu.concatenate %119, %128 in 0 : vector<8x32xf32>, vector<8x32xf32> -> vector<16x32xf32>
    %c0_26 = arith.constant 0 : index
    %c0_27 = arith.constant 0 : index
    %c0_28 = arith.constant 0 : index
    %130 = vector.load %arg6[%c0_26, %c0_27, %c0_28] : memref<2x32x32xf32, #tpu.memory_space<vmem>>, vector<1x32x32xf32>
    %131 = vector.shape_cast %130 : vector<1x32x32xf32> to vector<32x32xf32>
    %cst_29 = arith.constant dense<0.000000e+00> : vector<16x32xf32>
    %132 = tpu.matmul %129, %131, %cst_29 {dimension_numbers = #tpu.dot_dimension_numbers<[1], [0], [0], [1], [0, 0, 1, 1], [], []>} : vector<16x32xf32>, vector<32x32xf32>, vector<16x32xf32> -> vector<16x32xf32>
    %133 = vector.broadcast %28 : vector<1x32xf32> to vector<16x32xf32>
    %134 = arith.addf %132, %133 : vector<16x32xf32>
    %135 = arith.addf %24, %134 : vector<16x32xf32>
    %cst_30 = arith.constant dense<0.000000e+00> : vector<16xf32>
    %136 = vector.multi_reduction <add>, %135, %cst_30 [1] : vector<16x32xf32> to vector<16xf32>
    %137 = vector.shape_cast %136 : vector<16xf32> to vector<16x1xf32>
    %cst_31 = arith.constant 3.200000e+01 : f32
    %138 = vector.broadcast %cst_31 : f32 to vector<16x1xf32>
    %139 = arith.divf %137, %138 : vector<16x1xf32>
    %140 = vector.broadcast %139 : vector<16x1xf32> to vector<16x32xf32>
    %141 = arith.subf %135, %140 : vector<16x32xf32>
    %142 = arith.mulf %141, %141 : vector<16x32xf32>
    %cst_32 = arith.constant dense<0.000000e+00> : vector<16xf32>
    %143 = vector.multi_reduction <add>, %142, %cst_32 [1] : vector<16x32xf32> to vector<16xf32>
    %144 = vector.shape_cast %143 : vector<16xf32> to vector<16x1xf32>
    %cst_33 = arith.constant 3.200000e+01 : f32
    %145 = vector.broadcast %cst_33 : f32 to vector<16x1xf32>
    %146 = arith.divf %144, %145 : vector<16x1xf32>
    %147 = vector.broadcast %139 : vector<16x1xf32> to vector<16x32xf32>
    %148 = arith.subf %135, %147 : vector<16x32xf32>
    %cst_34 = arith.constant 9.99999974E-6 : f32
    %149 = vector.broadcast %cst_34 : f32 to vector<16x1xf32>
    %150 = arith.addf %146, %149 : vector<16x1xf32>
    %151 = math.rsqrt %150 : vector<16x1xf32>
    %152 = vector.broadcast %151 : vector<16x1xf32> to vector<16x32xf32>
    %153 = arith.mulf %148, %152 : vector<16x32xf32>
    %154 = vector.broadcast %29 : vector<1x32xf32> to vector<16x32xf32>
    %155 = arith.mulf %153, %154 : vector<16x32xf32>
    %156 = vector.broadcast %30 : vector<1x32xf32> to vector<16x32xf32>
    %157 = arith.addf %155, %156 : vector<16x32xf32>
    %c0_35 = arith.constant 0 : index
    %c0_36 = arith.constant 0 : index
    %c0_37 = arith.constant 0 : index
    %158 = vector.load %arg7[%c0_35, %c0_36, %c0_37] : memref<2x32x64xf32, #tpu.memory_space<vmem>>, vector<1x32x64xf32>
    %159 = vector.shape_cast %158 : vector<1x32x64xf32> to vector<32x64xf32>
    %cst_38 = arith.constant dense<0.000000e+00> : vector<16x64xf32>
    %160 = tpu.matmul %157, %159, %cst_38 {dimension_numbers = #tpu.dot_dimension_numbers<[1], [0], [0], [1], [0, 0, 1, 1], [], []>} : vector<16x32xf32>, vector<32x64xf32>, vector<16x64xf32> -> vector<16x64xf32>
    %c0_39 = arith.constant 0 : index
    %c0_40 = arith.constant 0 : index
    %c0_41 = arith.constant 0 : index
    %161 = vector.load %arg8[%c0_39, %c0_40, %c0_41] : memref<2x1x64xf32, #tpu.memory_space<vmem>>, vector<1x1x64xf32>
    %162 = vector.shape_cast %161 : vector<1x1x64xf32> to vector<1x64xf32>
    %163 = vector.broadcast %162 : vector<1x64xf32> to vector<16x64xf32>
    %164 = arith.addf %160, %163 : vector<16x64xf32>
    %165 = arith.mulf %164, %164 : vector<16x64xf32>
    %166 = arith.mulf %164, %165 : vector<16x64xf32>
    %cst_42 = arith.constant 4.471500e-02 : f32
    %167 = vector.broadcast %cst_42 : f32 to vector<16x64xf32>
    %168 = arith.mulf %167, %166 : vector<16x64xf32>
    %169 = arith.addf %164, %168 : vector<16x64xf32>
    %cst_43 = arith.constant 0.797884583 : f32
    %170 = vector.broadcast %cst_43 : f32 to vector<16x64xf32>
    %171 = arith.mulf %170, %169 : vector<16x64xf32>
    %172 = math.tanh %171 : vector<16x64xf32>
    %cst_44 = arith.constant 1.000000e+00 : f32
    %173 = vector.broadcast %cst_44 : f32 to vector<16x64xf32>
    %174 = arith.addf %173, %172 : vector<16x64xf32>
    %cst_45 = arith.constant 5.000000e-01 : f32
    %175 = vector.broadcast %cst_45 : f32 to vector<16x64xf32>
    %176 = arith.mulf %175, %174 : vector<16x64xf32>
    %177 = arith.mulf %164, %176 : vector<16x64xf32>
    %c0_46 = arith.constant 0 : index
    %c0_47 = arith.constant 0 : index
    %c0_48 = arith.constant 0 : index
    %178 = vector.load %arg9[%c0_46, %c0_47, %c0_48] : memref<2x64x32xf32, #tpu.memory_space<vmem>>, vector<1x64x32xf32>
    %179 = vector.shape_cast %178 : vector<1x64x32xf32> to vector<64x32xf32>
    %cst_49 = arith.constant dense<0.000000e+00> : vector<16x32xf32>
    %180 = tpu.matmul %177, %179, %cst_49 {dimension_numbers = #tpu.dot_dimension_numbers<[1], [0], [0], [1], [0, 0, 1, 1], [], []>} : vector<16x64xf32>, vector<64x32xf32>, vector<16x32xf32> -> vector<16x32xf32>
    %181 = vector.broadcast %31 : vector<1x32xf32> to vector<16x32xf32>
    %182 = arith.addf %180, %181 : vector<16x32xf32>
    %183 = arith.addf %157, %182 : vector<16x32xf32>
    %cst_50 = arith.constant dense<0.000000e+00> : vector<16xf32>
    %184 = vector.multi_reduction <add>, %183, %cst_50 [1] : vector<16x32xf32> to vector<16xf32>
    %185 = vector.shape_cast %184 : vector<16xf32> to vector<16x1xf32>
    %cst_51 = arith.constant 3.200000e+01 : f32
    %186 = vector.broadcast %cst_51 : f32 to vector<16x1xf32>
    %187 = arith.divf %185, %186 : vector<16x1xf32>
    %188 = vector.broadcast %187 : vector<16x1xf32> to vector<16x32xf32>
    %189 = arith.subf %183, %188 : vector<16x32xf32>
    %190 = arith.mulf %189, %189 : vector<16x32xf32>
    %cst_52 = arith.constant dense<0.000000e+00> : vector<16xf32>
    %191 = vector.multi_reduction <add>, %190, %cst_52 [1] : vector<16x32xf32> to vector<16xf32>
    %192 = vector.shape_cast %191 : vector<16xf32> to vector<16x1xf32>
    %cst_53 = arith.constant 3.200000e+01 : f32
    %193 = vector.broadcast %cst_53 : f32 to vector<16x1xf32>
    %194 = arith.divf %192, %193 : vector<16x1xf32>
    %195 = vector.broadcast %187 : vector<16x1xf32> to vector<16x32xf32>
    %196 = arith.subf %183, %195 : vector<16x32xf32>
    %cst_54 = arith.constant 9.99999974E-6 : f32
    %197 = vector.broadcast %cst_54 : f32 to vector<16x1xf32>
    %198 = arith.addf %194, %197 : vector<16x1xf32>
    %199 = math.rsqrt %198 : vector<16x1xf32>
    %200 = vector.broadcast %199 : vector<16x1xf32> to vector<16x32xf32>
    %201 = arith.mulf %196, %200 : vector<16x32xf32>
    %202 = vector.broadcast %32 : vector<1x32xf32> to vector<16x32xf32>
    %203 = arith.mulf %201, %202 : vector<16x32xf32>
    %204 = vector.broadcast %33 : vector<1x32xf32> to vector<16x32xf32>
    %205 = arith.addf %203, %204 : vector<16x32xf32>
    %c1_55 = arith.constant 1 : index
    %c0_56 = arith.constant 0 : index
    %c0_57 = arith.constant 0 : index
    %206 = vector.load %arg10[%c1_55, %c0_56, %c0_57] : memref<2x6x32xf32, #tpu.memory_space<vmem>>, vector<1x6x32xf32>
    %207 = vector.shape_cast %206 : vector<1x6x32xf32> to vector<6x32xf32>
    %208 = vector.extract_strided_slice %207 {offsets = [0, 0], sizes = [1, 32], strides = [1, 1]} : vector<6x32xf32> to vector<1x32xf32>
    %209 = vector.extract_strided_slice %207 {offsets = [1, 0], sizes = [1, 32], strides = [1, 1]} : vector<6x32xf32> to vector<1x32xf32>
    %210 = vector.extract_strided_slice %207 {offsets = [2, 0], sizes = [1, 32], strides = [1, 1]} : vector<6x32xf32> to vector<1x32xf32>
    %211 = vector.extract_strided_slice %207 {offsets = [3, 0], sizes = [1, 32], strides = [1, 1]} : vector<6x32xf32> to vector<1x32xf32>
    %212 = vector.extract_strided_slice %207 {offsets = [4, 0], sizes = [1, 32], strides = [1, 1]} : vector<6x32xf32> to vector<1x32xf32>
    %213 = vector.extract_strided_slice %207 {offsets = [5, 0], sizes = [1, 32], strides = [1, 1]} : vector<6x32xf32> to vector<1x32xf32>
    %c1_58 = arith.constant 1 : index
    %c0_59 = arith.constant 0 : index
    %c0_60 = arith.constant 0 : index
    %214 = vector.load %arg4[%c1_58, %c0_59, %c0_60] : memref<2x32x96xf32, #tpu.memory_space<vmem>>, vector<1x32x96xf32>
    %215 = vector.shape_cast %214 : vector<1x32x96xf32> to vector<32x96xf32>
    %cst_61 = arith.constant dense<0.000000e+00> : vector<16x96xf32>
    %216 = tpu.matmul %205, %215, %cst_61 {dimension_numbers = #tpu.dot_dimension_numbers<[1], [0], [0], [1], [0, 0, 1, 1], [], []>} : vector<16x32xf32>, vector<32x96xf32>, vector<16x96xf32> -> vector<16x96xf32>
    %c1_62 = arith.constant 1 : index
    %c0_63 = arith.constant 0 : index
    %c0_64 = arith.constant 0 : index
    %217 = vector.load %arg5[%c1_62, %c0_63, %c0_64] : memref<2x1x96xf32, #tpu.memory_space<vmem>>, vector<1x1x96xf32>
    %218 = vector.shape_cast %217 : vector<1x1x96xf32> to vector<1x96xf32>
    %219 = vector.broadcast %218 : vector<1x96xf32> to vector<16x96xf32>
    %220 = arith.addf %216, %219 : vector<16x96xf32>
    %221 = vector.extract_strided_slice %220 {offsets = [0, 0], sizes = [16, 32], strides = [1, 1]} : vector<16x96xf32> to vector<16x32xf32>
    %222 = vector.extract_strided_slice %221 {offsets = [0, 0], sizes = [8, 8], strides = [1, 1]} : vector<16x32xf32> to vector<8x8xf32>
    %223 = vector.shape_cast %222 : vector<8x8xf32> to vector<1x8x8xf32>
    %224 = vector.extract_strided_slice %221 {offsets = [8, 0], sizes = [8, 8], strides = [1, 1]} : vector<16x32xf32> to vector<8x8xf32>
    %225 = vector.shape_cast %224 : vector<8x8xf32> to vector<1x8x8xf32>
    %226 = vector.extract_strided_slice %221 {offsets = [0, 8], sizes = [8, 8], strides = [1, 1]} : vector<16x32xf32> to vector<8x8xf32>
    %227 = vector.shape_cast %226 : vector<8x8xf32> to vector<1x8x8xf32>
    %228 = vector.extract_strided_slice %221 {offsets = [8, 8], sizes = [8, 8], strides = [1, 1]} : vector<16x32xf32> to vector<8x8xf32>
    %229 = vector.shape_cast %228 : vector<8x8xf32> to vector<1x8x8xf32>
    %230 = vector.extract_strided_slice %221 {offsets = [0, 16], sizes = [8, 8], strides = [1, 1]} : vector<16x32xf32> to vector<8x8xf32>
    %231 = vector.shape_cast %230 : vector<8x8xf32> to vector<1x8x8xf32>
    %232 = vector.extract_strided_slice %221 {offsets = [8, 16], sizes = [8, 8], strides = [1, 1]} : vector<16x32xf32> to vector<8x8xf32>
    %233 = vector.shape_cast %232 : vector<8x8xf32> to vector<1x8x8xf32>
    %234 = vector.extract_strided_slice %221 {offsets = [0, 24], sizes = [8, 8], strides = [1, 1]} : vector<16x32xf32> to vector<8x8xf32>
    %235 = vector.shape_cast %234 : vector<8x8xf32> to vector<1x8x8xf32>
    %236 = vector.extract_strided_slice %221 {offsets = [8, 24], sizes = [8, 8], strides = [1, 1]} : vector<16x32xf32> to vector<8x8xf32>
    %237 = vector.shape_cast %236 : vector<8x8xf32> to vector<1x8x8xf32>
    %238 = tpu.concatenate %223, %225, %227, %229, %231, %233, %235, %237 in 0 : vector<1x8x8xf32>, vector<1x8x8xf32>, vector<1x8x8xf32>, vector<1x8x8xf32>, vector<1x8x8xf32>, vector<1x8x8xf32>, vector<1x8x8xf32>, vector<1x8x8xf32> -> vector<8x8x8xf32>
    %239 = vector.extract_strided_slice %220 {offsets = [0, 32], sizes = [16, 32], strides = [1, 1]} : vector<16x96xf32> to vector<16x32xf32>
    %240 = vector.extract_strided_slice %239 {offsets = [0, 0], sizes = [8, 8], strides = [1, 1]} : vector<16x32xf32> to vector<8x8xf32>
    %241 = vector.shape_cast %240 : vector<8x8xf32> to vector<1x8x8xf32>
    %242 = vector.extract_strided_slice %239 {offsets = [8, 0], sizes = [8, 8], strides = [1, 1]} : vector<16x32xf32> to vector<8x8xf32>
    %243 = vector.shape_cast %242 : vector<8x8xf32> to vector<1x8x8xf32>
    %244 = vector.extract_strided_slice %239 {offsets = [0, 8], sizes = [8, 8], strides = [1, 1]} : vector<16x32xf32> to vector<8x8xf32>
    %245 = vector.shape_cast %244 : vector<8x8xf32> to vector<1x8x8xf32>
    %246 = vector.extract_strided_slice %239 {offsets = [8, 8], sizes = [8, 8], strides = [1, 1]} : vector<16x32xf32> to vector<8x8xf32>
    %247 = vector.shape_cast %246 : vector<8x8xf32> to vector<1x8x8xf32>
    %248 = vector.extract_strided_slice %239 {offsets = [0, 16], sizes = [8, 8], strides = [1, 1]} : vector<16x32xf32> to vector<8x8xf32>
    %249 = vector.shape_cast %248 : vector<8x8xf32> to vector<1x8x8xf32>
    %250 = vector.extract_strided_slice %239 {offsets = [8, 16], sizes = [8, 8], strides = [1, 1]} : vector<16x32xf32> to vector<8x8xf32>
    %251 = vector.shape_cast %250 : vector<8x8xf32> to vector<1x8x8xf32>
    %252 = vector.extract_strided_slice %239 {offsets = [0, 24], sizes = [8, 8], strides = [1, 1]} : vector<16x32xf32> to vector<8x8xf32>
    %253 = vector.shape_cast %252 : vector<8x8xf32> to vector<1x8x8xf32>
    %254 = vector.extract_strided_slice %239 {offsets = [8, 24], sizes = [8, 8], strides = [1, 1]} : vector<16x32xf32> to vector<8x8xf32>
    %255 = vector.shape_cast %254 : vector<8x8xf32> to vector<1x8x8xf32>
    %256 = tpu.concatenate %241, %243, %245, %247, %249, %251, %253, %255 in 0 : vector<1x8x8xf32>, vector<1x8x8xf32>, vector<1x8x8xf32>, vector<1x8x8xf32>, vector<1x8x8xf32>, vector<1x8x8xf32>, vector<1x8x8xf32>, vector<1x8x8xf32> -> vector<8x8x8xf32>
    %257 = vector.extract_strided_slice %220 {offsets = [0, 64], sizes = [16, 32], strides = [1, 1]} : vector<16x96xf32> to vector<16x32xf32>
    %258 = vector.extract_strided_slice %257 {offsets = [0, 0], sizes = [8, 8], strides = [1, 1]} : vector<16x32xf32> to vector<8x8xf32>
    %259 = vector.shape_cast %258 : vector<8x8xf32> to vector<1x8x8xf32>
    %260 = vector.extract_strided_slice %257 {offsets = [8, 0], sizes = [8, 8], strides = [1, 1]} : vector<16x32xf32> to vector<8x8xf32>
    %261 = vector.shape_cast %260 : vector<8x8xf32> to vector<1x8x8xf32>
    %262 = vector.extract_strided_slice %257 {offsets = [0, 8], sizes = [8, 8], strides = [1, 1]} : vector<16x32xf32> to vector<8x8xf32>
    %263 = vector.shape_cast %262 : vector<8x8xf32> to vector<1x8x8xf32>
    %264 = vector.extract_strided_slice %257 {offsets = [8, 8], sizes = [8, 8], strides = [1, 1]} : vector<16x32xf32> to vector<8x8xf32>
    %265 = vector.shape_cast %264 : vector<8x8xf32> to vector<1x8x8xf32>
    %266 = vector.extract_strided_slice %257 {offsets = [0, 16], sizes = [8, 8], strides = [1, 1]} : vector<16x32xf32> to vector<8x8xf32>
    %267 = vector.shape_cast %266 : vector<8x8xf32> to vector<1x8x8xf32>
    %268 = vector.extract_strided_slice %257 {offsets = [8, 16], sizes = [8, 8], strides = [1, 1]} : vector<16x32xf32> to vector<8x8xf32>
    %269 = vector.shape_cast %268 : vector<8x8xf32> to vector<1x8x8xf32>
    %270 = vector.extract_strided_slice %257 {offsets = [0, 24], sizes = [8, 8], strides = [1, 1]} : vector<16x32xf32> to vector<8x8xf32>
    %271 = vector.shape_cast %270 : vector<8x8xf32> to vector<1x8x8xf32>
    %272 = vector.extract_strided_slice %257 {offsets = [8, 24], sizes = [8, 8], strides = [1, 1]} : vector<16x32xf32> to vector<8x8xf32>
    %273 = vector.shape_cast %272 : vector<8x8xf32> to vector<1x8x8xf32>
    %274 = tpu.concatenate %259, %261, %263, %265, %267, %269, %271, %273 in 0 : vector<1x8x8xf32>, vector<1x8x8xf32>, vector<1x8x8xf32>, vector<1x8x8xf32>, vector<1x8x8xf32>, vector<1x8x8xf32>, vector<1x8x8xf32>, vector<1x8x8xf32> -> vector<8x8x8xf32>
    "tpu.trace_start"() <{level = 10 : i32, message = "gqd,gkd->gqk"}> : () -> ()
    %cst_65 = arith.constant dense<0.000000e+00> : vector<8x8x8xf32>
    %275 = tpu.matmul %238, %256, %cst_65 {dimension_numbers = #tpu.dot_dimension_numbers<[2], [2], [1], [1], [0, 0, 0, 1, 1, 1], [0], [0]>} : vector<8x8x8xf32>, vector<8x8x8xf32>, vector<8x8x8xf32> -> vector<8x8x8xf32>
    "tpu.trace_stop"() : () -> ()
    %cst_66 = arith.constant 0.353553385 : f32
    %276 = vector.broadcast %cst_66 : f32 to vector<8x8x8xf32>
    %277 = arith.mulf %275, %276 : vector<8x8x8xf32>
    %278 = vector.broadcast %25 : vector<8x1x8xf32> to vector<8x8x8xf32>
    %279 = arith.addf %277, %278 : vector<8x8x8xf32>
    %cst_67 = arith.constant dense<0xFF800000> : vector<8x8xf32>
    %280 = vector.multi_reduction <maximumf>, %279, %cst_67 [2] : vector<8x8x8xf32> to vector<8x8xf32>
    %281 = vector.shape_cast %280 : vector<8x8xf32> to vector<8x8x1xf32>
    %282 = vector.broadcast %281 : vector<8x8x1xf32> to vector<8x8x8xf32>
    %283 = arith.subf %279, %282 : vector<8x8x8xf32>
    %284 = math.exp %283 : vector<8x8x8xf32>
    %cst_68 = arith.constant dense<0.000000e+00> : vector<8x8xf32>
    %285 = vector.multi_reduction <add>, %284, %cst_68 [2] : vector<8x8x8xf32> to vector<8x8xf32>
    %286 = vector.shape_cast %285 : vector<8x8xf32> to vector<8x8x1xf32>
    %287 = tpu.reciprocal %286 {approx = true} : vector<8x8x1xf32> -> vector<8x8x1xf32>
    %288 = vector.broadcast %287 : vector<8x8x1xf32> to vector<8x8x8xf32>
    %289 = arith.mulf %284, %288 : vector<8x8x8xf32>
    "tpu.trace_start"() <{level = 10 : i32, message = "gqk,gkd->gqd"}> : () -> ()
    %cst_69 = arith.constant dense<0.000000e+00> : vector<8x8x8xf32>
    %290 = tpu.matmul %289, %274, %cst_69 {dimension_numbers = #tpu.dot_dimension_numbers<[2], [1], [1], [2], [0, 0, 0, 1, 1, 2], [0], [0]>} : vector<8x8x8xf32>, vector<8x8x8xf32>, vector<8x8x8xf32> -> vector<8x8x8xf32>
    "tpu.trace_stop"() : () -> ()
    %291 = vector.extract_strided_slice %290 {offsets = [0, 0, 0], sizes = [1, 8, 8], strides = [1, 1, 1]} : vector<8x8x8xf32> to vector<1x8x8xf32>
    %292 = vector.shape_cast %291 : vector<1x8x8xf32> to vector<8x8xf32>
    %293 = vector.extract_strided_slice %290 {offsets = [2, 0, 0], sizes = [1, 8, 8], strides = [1, 1, 1]} : vector<8x8x8xf32> to vector<1x8x8xf32>
    %294 = vector.shape_cast %293 : vector<1x8x8xf32> to vector<8x8xf32>
    %295 = vector.extract_strided_slice %290 {offsets = [4, 0, 0], sizes = [1, 8, 8], strides = [1, 1, 1]} : vector<8x8x8xf32> to vector<1x8x8xf32>
    %296 = vector.shape_cast %295 : vector<1x8x8xf32> to vector<8x8xf32>
    %297 = vector.extract_strided_slice %290 {offsets = [6, 0, 0], sizes = [1, 8, 8], strides = [1, 1, 1]} : vector<8x8x8xf32> to vector<1x8x8xf32>
    %298 = vector.shape_cast %297 : vector<1x8x8xf32> to vector<8x8xf32>
    %299 = tpu.concatenate %292, %294, %296, %298 in 1 : vector<8x8xf32>, vector<8x8xf32>, vector<8x8xf32>, vector<8x8xf32> -> vector<8x32xf32>
    %300 = vector.extract_strided_slice %290 {offsets = [1, 0, 0], sizes = [1, 8, 8], strides = [1, 1, 1]} : vector<8x8x8xf32> to vector<1x8x8xf32>
    %301 = vector.shape_cast %300 : vector<1x8x8xf32> to vector<8x8xf32>
    %302 = vector.extract_strided_slice %290 {offsets = [3, 0, 0], sizes = [1, 8, 8], strides = [1, 1, 1]} : vector<8x8x8xf32> to vector<1x8x8xf32>
    %303 = vector.shape_cast %302 : vector<1x8x8xf32> to vector<8x8xf32>
    %304 = vector.extract_strided_slice %290 {offsets = [5, 0, 0], sizes = [1, 8, 8], strides = [1, 1, 1]} : vector<8x8x8xf32> to vector<1x8x8xf32>
    %305 = vector.shape_cast %304 : vector<1x8x8xf32> to vector<8x8xf32>
    %306 = vector.extract_strided_slice %290 {offsets = [7, 0, 0], sizes = [1, 8, 8], strides = [1, 1, 1]} : vector<8x8x8xf32> to vector<1x8x8xf32>
    %307 = vector.shape_cast %306 : vector<1x8x8xf32> to vector<8x8xf32>
    %308 = tpu.concatenate %301, %303, %305, %307 in 1 : vector<8x8xf32>, vector<8x8xf32>, vector<8x8xf32>, vector<8x8xf32> -> vector<8x32xf32>
    %309 = tpu.concatenate %299, %308 in 0 : vector<8x32xf32>, vector<8x32xf32> -> vector<16x32xf32>
    %c1_70 = arith.constant 1 : index
    %c0_71 = arith.constant 0 : index
    %c0_72 = arith.constant 0 : index
    %310 = vector.load %arg6[%c1_70, %c0_71, %c0_72] : memref<2x32x32xf32, #tpu.memory_space<vmem>>, vector<1x32x32xf32>
    %311 = vector.shape_cast %310 : vector<1x32x32xf32> to vector<32x32xf32>
    %cst_73 = arith.constant dense<0.000000e+00> : vector<16x32xf32>
    %312 = tpu.matmul %309, %311, %cst_73 {dimension_numbers = #tpu.dot_dimension_numbers<[1], [0], [0], [1], [0, 0, 1, 1], [], []>} : vector<16x32xf32>, vector<32x32xf32>, vector<16x32xf32> -> vector<16x32xf32>
    %313 = vector.broadcast %208 : vector<1x32xf32> to vector<16x32xf32>
    %314 = arith.addf %312, %313 : vector<16x32xf32>
    %315 = arith.addf %205, %314 : vector<16x32xf32>
    %cst_74 = arith.constant dense<0.000000e+00> : vector<16xf32>
    %316 = vector.multi_reduction <add>, %315, %cst_74 [1] : vector<16x32xf32> to vector<16xf32>
    %317 = vector.shape_cast %316 : vector<16xf32> to vector<16x1xf32>
    %cst_75 = arith.constant 3.200000e+01 : f32
    %318 = vector.broadcast %cst_75 : f32 to vector<16x1xf32>
    %319 = arith.divf %317, %318 : vector<16x1xf32>
    %320 = vector.broadcast %319 : vector<16x1xf32> to vector<16x32xf32>
    %321 = arith.subf %315, %320 : vector<16x32xf32>
    %322 = arith.mulf %321, %321 : vector<16x32xf32>
    %cst_76 = arith.constant dense<0.000000e+00> : vector<16xf32>
    %323 = vector.multi_reduction <add>, %322, %cst_76 [1] : vector<16x32xf32> to vector<16xf32>
    %324 = vector.shape_cast %323 : vector<16xf32> to vector<16x1xf32>
    %cst_77 = arith.constant 3.200000e+01 : f32
    %325 = vector.broadcast %cst_77 : f32 to vector<16x1xf32>
    %326 = arith.divf %324, %325 : vector<16x1xf32>
    %327 = vector.broadcast %319 : vector<16x1xf32> to vector<16x32xf32>
    %328 = arith.subf %315, %327 : vector<16x32xf32>
    %cst_78 = arith.constant 9.99999974E-6 : f32
    %329 = vector.broadcast %cst_78 : f32 to vector<16x1xf32>
    %330 = arith.addf %326, %329 : vector<16x1xf32>
    %331 = math.rsqrt %330 : vector<16x1xf32>
    %332 = vector.broadcast %331 : vector<16x1xf32> to vector<16x32xf32>
    %333 = arith.mulf %328, %332 : vector<16x32xf32>
    %334 = vector.broadcast %209 : vector<1x32xf32> to vector<16x32xf32>
    %335 = arith.mulf %333, %334 : vector<16x32xf32>
    %336 = vector.broadcast %210 : vector<1x32xf32> to vector<16x32xf32>
    %337 = arith.addf %335, %336 : vector<16x32xf32>
    %c1_79 = arith.constant 1 : index
    %c0_80 = arith.constant 0 : index
    %c0_81 = arith.constant 0 : index
    %338 = vector.load %arg7[%c1_79, %c0_80, %c0_81] : memref<2x32x64xf32, #tpu.memory_space<vmem>>, vector<1x32x64xf32>
    %339 = vector.shape_cast %338 : vector<1x32x64xf32> to vector<32x64xf32>
    %cst_82 = arith.constant dense<0.000000e+00> : vector<16x64xf32>
    %340 = tpu.matmul %337, %339, %cst_82 {dimension_numbers = #tpu.dot_dimension_numbers<[1], [0], [0], [1], [0, 0, 1, 1], [], []>} : vector<16x32xf32>, vector<32x64xf32>, vector<16x64xf32> -> vector<16x64xf32>
    %c1_83 = arith.constant 1 : index
    %c0_84 = arith.constant 0 : index
    %c0_85 = arith.constant 0 : index
    %341 = vector.load %arg8[%c1_83, %c0_84, %c0_85] : memref<2x1x64xf32, #tpu.memory_space<vmem>>, vector<1x1x64xf32>
    %342 = vector.shape_cast %341 : vector<1x1x64xf32> to vector<1x64xf32>
    %343 = vector.broadcast %342 : vector<1x64xf32> to vector<16x64xf32>
    %344 = arith.addf %340, %343 : vector<16x64xf32>
    %345 = arith.mulf %344, %344 : vector<16x64xf32>
    %346 = arith.mulf %344, %345 : vector<16x64xf32>
    %cst_86 = arith.constant 4.471500e-02 : f32
    %347 = vector.broadcast %cst_86 : f32 to vector<16x64xf32>
    %348 = arith.mulf %347, %346 : vector<16x64xf32>
    %349 = arith.addf %344, %348 : vector<16x64xf32>
    %cst_87 = arith.constant 0.797884583 : f32
    %350 = vector.broadcast %cst_87 : f32 to vector<16x64xf32>
    %351 = arith.mulf %350, %349 : vector<16x64xf32>
    %352 = math.tanh %351 : vector<16x64xf32>
    %cst_88 = arith.constant 1.000000e+00 : f32
    %353 = vector.broadcast %cst_88 : f32 to vector<16x64xf32>
    %354 = arith.addf %353, %352 : vector<16x64xf32>
    %cst_89 = arith.constant 5.000000e-01 : f32
    %355 = vector.broadcast %cst_89 : f32 to vector<16x64xf32>
    %356 = arith.mulf %355, %354 : vector<16x64xf32>
    %357 = arith.mulf %344, %356 : vector<16x64xf32>
    %c1_90 = arith.constant 1 : index
    %c0_91 = arith.constant 0 : index
    %c0_92 = arith.constant 0 : index
    %358 = vector.load %arg9[%c1_90, %c0_91, %c0_92] : memref<2x64x32xf32, #tpu.memory_space<vmem>>, vector<1x64x32xf32>
    %359 = vector.shape_cast %358 : vector<1x64x32xf32> to vector<64x32xf32>
    %cst_93 = arith.constant dense<0.000000e+00> : vector<16x32xf32>
    %360 = tpu.matmul %357, %359, %cst_93 {dimension_numbers = #tpu.dot_dimension_numbers<[1], [0], [0], [1], [0, 0, 1, 1], [], []>} : vector<16x64xf32>, vector<64x32xf32>, vector<16x32xf32> -> vector<16x32xf32>
    %361 = vector.broadcast %211 : vector<1x32xf32> to vector<16x32xf32>
    %362 = arith.addf %360, %361 : vector<16x32xf32>
    %363 = arith.addf %337, %362 : vector<16x32xf32>
    %cst_94 = arith.constant dense<0.000000e+00> : vector<16xf32>
    %364 = vector.multi_reduction <add>, %363, %cst_94 [1] : vector<16x32xf32> to vector<16xf32>
    %365 = vector.shape_cast %364 : vector<16xf32> to vector<16x1xf32>
    %cst_95 = arith.constant 3.200000e+01 : f32
    %366 = vector.broadcast %cst_95 : f32 to vector<16x1xf32>
    %367 = arith.divf %365, %366 : vector<16x1xf32>
    %368 = vector.broadcast %367 : vector<16x1xf32> to vector<16x32xf32>
    %369 = arith.subf %363, %368 : vector<16x32xf32>
    %370 = arith.mulf %369, %369 : vector<16x32xf32>
    %cst_96 = arith.constant dense<0.000000e+00> : vector<16xf32>
    %371 = vector.multi_reduction <add>, %370, %cst_96 [1] : vector<16x32xf32> to vector<16xf32>
    %372 = vector.shape_cast %371 : vector<16xf32> to vector<16x1xf32>
    %cst_97 = arith.constant 3.200000e+01 : f32
    %373 = vector.broadcast %cst_97 : f32 to vector<16x1xf32>
    %374 = arith.divf %372, %373 : vector<16x1xf32>
    %375 = vector.broadcast %367 : vector<16x1xf32> to vector<16x32xf32>
    %376 = arith.subf %363, %375 : vector<16x32xf32>
    %cst_98 = arith.constant 9.99999974E-6 : f32
    %377 = vector.broadcast %cst_98 : f32 to vector<16x1xf32>
    %378 = arith.addf %374, %377 : vector<16x1xf32>
    %379 = math.rsqrt %378 : vector<16x1xf32>
    %380 = vector.broadcast %379 : vector<16x1xf32> to vector<16x32xf32>
    %381 = arith.mulf %376, %380 : vector<16x32xf32>
    %382 = vector.broadcast %212 : vector<1x32xf32> to vector<16x32xf32>
    %383 = arith.mulf %381, %382 : vector<16x32xf32>
    %384 = vector.broadcast %213 : vector<1x32xf32> to vector<16x32xf32>
    %385 = arith.addf %383, %384 : vector<16x32xf32>
    %c0_99 = arith.constant 0 : index
    %c0_100 = arith.constant 0 : index
    %386 = vector.load %arg11[%c0_99, %c0_100] : memref<32x128xf32, #tpu.memory_space<vmem>>, vector<32x128xf32>
    %cst_101 = arith.constant dense<0.000000e+00> : vector<16x128xf32>
    %387 = tpu.matmul %385, %386, %cst_101 {dimension_numbers = #tpu.dot_dimension_numbers<[1], [0], [0], [1], [0, 0, 1, 1], [], []>} : vector<16x32xf32>, vector<32x128xf32>, vector<16x128xf32> -> vector<16x128xf32>
    %c0_102 = arith.constant 0 : index
    %c0_103 = arith.constant 0 : index
    %388 = vector.load %arg12[%c0_102, %c0_103] : memref<1x128xf32, #tpu.memory_space<vmem>>, vector<1x128xf32>
    %389 = vector.broadcast %388 : vector<1x128xf32> to vector<16x128xf32>
    %390 = arith.addf %387, %389 : vector<16x128xf32>
    %cst_104 = arith.constant 0.000000e+00 : f32
    %391 = vector.broadcast %cst_104 : f32 to vector<16x128xf32>
    %392 = arith.maximumf %390, %391 : vector<16x128xf32>
    %c0_105 = arith.constant 0 : index
    %c0_106 = arith.constant 0 : index
    %393 = vector.load %arg13[%c0_105, %c0_106] : memref<128x128xf32, #tpu.memory_space<vmem>>, vector<128x128xf32>
    %cst_107 = arith.constant dense<0.000000e+00> : vector<16x128xf32>
    %394 = tpu.matmul %392, %393, %cst_107 {dimension_numbers = #tpu.dot_dimension_numbers<[1], [0], [0], [1], [0, 0, 1, 1], [], []>} : vector<16x128xf32>, vector<128x128xf32>, vector<16x128xf32> -> vector<16x128xf32>
    %c0_108 = arith.constant 0 : index
    %c0_109 = arith.constant 0 : index
    %395 = vector.load %arg14[%c0_108, %c0_109] : memref<1x128xf32, #tpu.memory_space<vmem>>, vector<1x128xf32>
    %396 = vector.broadcast %395 : vector<1x128xf32> to vector<16x128xf32>
    %397 = arith.addf %394, %396 : vector<16x128xf32>
    %c0_110 = arith.constant 0 : index
    %c0_111 = arith.constant 0 : index
    %398 = vector.load %arg15[%c0_110, %c0_111] : memref<16x128xf32, #tpu.memory_space<vmem>>, vector<16x128xf32>
    tpu.vector_store %arg15[%c0_110, %c0_111], %397 {strides = array<i32>} : memref<16x128xf32, #tpu.memory_space<vmem>>, vector<16x128xf32>,
    return
  }
  func.func @transform_0(%arg0: i32) -> (i32, i32) {
    %c0_i32 = arith.constant 0 : i32
    %c0_i32_0 = arith.constant 0 : i32
    %c0_i32_1 = arith.constant 0 : i32
    return %c0_i32, %c0_i32_0 : i32, i32
  }
  func.func @transform_1(%arg0: i32) -> (i32, i32, i32) {
    %c0_i32 = arith.constant 0 : i32
    %c0_i32_0 = arith.constant 0 : i32
    %c0_i32_1 = arith.constant 0 : i32
    %c0_i32_2 = arith.constant 0 : i32
    return %c0_i32, %c0_i32_0, %c0_i32_1 : i32, i32, i32
  }
  func.func @transform_2(%arg0: i32) -> (i32, i32) {
    %c0_i32 = arith.constant 0 : i32
    %c0_i32_0 = arith.constant 0 : i32
    %c0_i32_1 = arith.constant 0 : i32
    return %c0_i32, %c0_i32_0 : i32, i32
  }
  func.func @transform_3(%arg0: i32) -> (i32, i32, i32) {
    %c0_i32 = arith.constant 0 : i32
    %c0_i32_0 = arith.constant 0 : i32
    %c0_i32_1 = arith.constant 0 : i32
    %c0_i32_2 = arith.constant 0 : i32
    return %c0_i32, %c0_i32_0, %c0_i32_1 : i32, i32, i32
  }
  func.func @transform_4(%arg0: i32) -> (i32, i32, i32) {
    %c0_i32 = arith.constant 0 : i32
    %c0_i32_0 = arith.constant 0 : i32
    %c0_i32_1 = arith.constant 0 : i32
    %c0_i32_2 = arith.constant 0 : i32
    return %c0_i32, %c0_i32_0, %c0_i32_1 : i32, i32, i32
  }
  func.func @transform_5(%arg0: i32) -> (i32, i32, i32) {
    %c0_i32 = arith.constant 0 : i32
    %c0_i32_0 = arith.constant 0 : i32
    %c0_i32_1 = arith.constant 0 : i32
    %c0_i32_2 = arith.constant 0 : i32
    return %c0_i32, %c0_i32_0, %c0_i32_1 : i32, i32, i32
  }
  func.func @transform_6(%arg0: i32) -> (i32, i32, i32) {
    %c0_i32 = arith.constant 0 : i32
    %c0_i32_0 = arith.constant 0 : i32
    %c0_i32_1 = arith.constant 0 : i32
    %c0_i32_2 = arith.constant 0 : i32
    return %c0_i32, %c0_i32_0, %c0_i32_1 : i32, i32, i32
  }
  func.func @transform_7(%arg0: i32) -> (i32, i32, i32) {
    %c0_i32 = arith.constant 0 : i32
    %c0_i32_0 = arith.constant 0 : i32
    %c0_i32_1 = arith.constant 0 : i32
    %c0_i32_2 = arith.constant 0 : i32
    return %c0_i32, %c0_i32_0, %c0_i32_1 : i32, i32, i32
  }
  func.func @transform_8(%arg0: i32) -> (i32, i32, i32) {
    %c0_i32 = arith.constant 0 : i32
    %c0_i32_0 = arith.constant 0 : i32
    %c0_i32_1 = arith.constant 0 : i32
    %c0_i32_2 = arith.constant 0 : i32
    return %c0_i32, %c0_i32_0, %c0_i32_1 : i32, i32, i32
  }
  func.func @transform_9(%arg0: i32) -> (i32, i32, i32) {
    %c0_i32 = arith.constant 0 : i32
    %c0_i32_0 = arith.constant 0 : i32
    %c0_i32_1 = arith.constant 0 : i32
    %c0_i32_2 = arith.constant 0 : i32
    return %c0_i32, %c0_i32_0, %c0_i32_1 : i32, i32, i32
  }
  func.func @transform_10(%arg0: i32) -> (i32, i32) {
    %c0_i32 = arith.constant 0 : i32
    %c0_i32_0 = arith.constant 0 : i32
    %c0_i32_1 = arith.constant 0 : i32
    return %c0_i32, %c0_i32_0 : i32, i32
  }
  func.func @transform_11(%arg0: i32) -> (i32, i32) {
    %c0_i32 = arith.constant 0 : i32
    %c0_i32_0 = arith.constant 0 : i32
    %c0_i32_1 = arith.constant 0 : i32
    return %c0_i32, %c0_i32_0 : i32, i32
  }
  func.func @transform_12(%arg0: i32) -> (i32, i32) {
    %c0_i32 = arith.constant 0 : i32
    %c0_i32_0 = arith.constant 0 : i32
    %c0_i32_1 = arith.constant 0 : i32
    return %c0_i32, %c0_i32_0 : i32, i32
  }
  func.func @transform_13(%arg0: i32) -> (i32, i32) {
    %c0_i32 = arith.constant 0 : i32
    %c0_i32_0 = arith.constant 0 : i32
    %c0_i32_1 = arith.constant 0 : i32
    return %c0_i32, %c0_i32_0 : i32, i32
  }
  func.func @transform_14(%arg0: i32) -> (i32, i32) {
    %c0_i32 = arith.constant 0 : i32
    %c0_i32_0 = arith.constant 0 : i32
    %c0_i32_1 = arith.constant 0 : i32
    return %c0_i32, %c0_i32_0 : i32, i32
  }
}

</mosaic_0001>

<bundles_post_ra>
// kernel: roberta_class_forward.1
= control target key start
LH: loop header
LB: loop body
LE: loop exit
PB: predicated region body
PF: predicated region fallthrough
CT: control target
= control target key end

     0   :  { %vm51_vm0 = vcmask 261120   ;;  %v4675_v35 = vmov 0.0   ;;  %vm4676_vm1 = vmmov 0   ;;  %s4678_s30 = smov 112   ;;  %s4679_s15 = smov 104   ;;  %vm208_vm2 = vcmask 64512   ;;  %s5516_s0 = inlined_call_operand.vmem [shape: f32[16,32], index: 0, kind: input, shape index: {}]   ;;  %s5517_s3 = inlined_call_operand.vmem [shape: f32[2,32,96], index: 3, kind: input, shape index: {}]   ;;  %s5518_s2 = inlined_call_operand.vmem [shape: f32[2,32], index: 2, kind: input, shape index: {}]   ;;  %s5519_s4 = inlined_call_operand.vmem [shape: f32[2,1,96], index: 4, kind: input, shape index: {}]   ;;  %s5520_s1 = inlined_call_operand.vmem [shape: f32[8,1,8], index: 1, kind: input, shape index: {}]   ;;  %s5521_s5 = inlined_call_operand.vmem [shape: f32[2,32,32], index: 5, kind: input, shape index: {}]   ;;  %s5522_s9 = inlined_call_operand.vmem [shape: f32[2,6,32], index: 9, kind: input, shape index: {}]   ;;  %s5523_s6 = inlined_call_operand.vmem [shape: f32[2,32,64], index: 6, kind: input, shape index: {}]   ;;  %s5524_s8 = inlined_call_operand.vmem [shape: f32[2,64,32], index: 8, kind: input, shape index: {}]   ;;  %s5525_s7 = inlined_call_operand.vmem [shape: f32[2,1,64], index: 7, kind: input, shape index: {}]   ;;  %s5526_s10 = inlined_call_operand.vmem [shape: f32[32,128], index: 10, kind: input, shape index: {}]   ;;  %s5527_s12 = inlined_call_operand.vmem [shape: f32[128,128], index: 12, kind: input, shape index: {}]   ;;  %s5528_s11 = inlined_call_operand.vmem [shape: f32[1,128], index: 11, kind: input, shape index: {}]   ;;  %s5529_s13 = inlined_call_operand.vmem [shape: f32[1,128], index: 13, kind: input, shape index: {}]   ;;  %s5530_s14 = inlined_call_operand.vmem [shape: f32[16,128], index: 14, kind: output, shape index: {}]  }
   0x1   :  { %v47_v0 = vld [vmem:[%s5516_s0] sm:$0xff]  ;;  %v48_v1 = vld [vmem:[%s5516_s0 + $0x8] sm:$0xff]  ;;  %v103_v14 = vld [vmem:[%s5517_s3 + $0x18] sm:$0xff]  ;;  %4279 = vmatprep.subr.mxu1 %v4675_v35  ;;  %4281 = vmatprep.mubr.msk.f32.mxu1 %vm4676_vm1, %v4675_v35  ;;  %s4680_s16 = smov 96   ;;  %s4682_s22 = smov 8   ;;  %vm1588_vm3 = vcmask 130048  }
   0x2   :  { %v52_v2 = vsel %vm51_vm0, %v47_v0, 0.0  ;;  %v55_v3 = vsel %vm51_vm0, %v48_v1, 0.0  ;;  %v102_v15 = vld [vmem:[%s5517_s3 + $0x10] sm:$0xff]  ;;  %4263 = vmatprep.subr.mxu0 %v103_v14  ;;  %v101_v16 = vld [vmem:[%s5517_s3 + $0x8] sm:$0xff]  ;;  %v100_v17 = vld [vmem:[%s5517_s3] sm:$0xff]  ;;  %s4683_s27 = smov 16  }
   0x3   :  { %53 = vadd.xlane.f32.xlu0 %v52_v2  ;;  %4264 = vmatpush3.msra.mxu0 %v103_v14  ;;  %v4014_v25 = vld [vmem:[%s5518_s2] ss:$0 sm:$0xff]  ;;  %v4015_v27 = vld [vmem:[%s5518_s2 + $0x1] ss:$0 sm:$0xff]  ;;  %s4677_s2 = smov 120   ;;  %s4684_s28 = smov 24  }
   0x4   :  { %4265 = vmatprep.subr.mxu0 %v102_v15  ;;  %v4016_v34 = vld [vmem:[%s5519_s4] ss:$0 sm:$0xff]  ;;  %v4907_v61 = vld [vmem:[%s5520_s1 + $0x1] ss:$0 sm:$0xff]  ;;  %v4927_v14 = vld [vmem:[%s5520_s1 + $0x4] ss:$0 sm:$0xff] }
   0x5   :  { %4266 = vmatpush3.msra.mxu0 %v102_v15  ;;  %v4900_v55 = vld [vmem:[%s5520_s1] ss:$0 sm:$0xff]  ;;  %vm1590_vm4 = vcmask 195584   ;;  %vm1858_vm5 = vcmask 523264  }
   0x6   :  { %4267 = vmatprep.subr.mxu0 %v101_v16 }
   0x7   :  { %56 = vadd.xlane.f32.xlu0 %v55_v3  ;;  %4268 = vmatpush3.msra.mxu0 %v101_v16  ;;  %v4914_v3 = vld [vmem:[%s5520_s1 + $0x3] ss:$0 sm:$0xff] }
   0x8   :  { %4269 = vmatprep.subr.mxu0 %v100_v17 }
   0x9   :  { %4270 = vmatpush3.msra.mxu0 %v100_v17 }
   0xa   :  { %4274 = vmatprep.subr.mxu0 %v4675_v35 }
  0x8c   :  { %v54_v4 = vpop.xlane.xlu0 %53 }
  0x8d   :  { %v59_v5 = vmul.f32 0.03125, %v54_v4 }
  0x8f   :  { %v61_v6 = vsub.f32 %v47_v0, %v59_v5 }
  0x90   :  { %v57_v7 = vpop.xlane.xlu0 %56 }
  0x91   :  { %v60_v8 = vmul.f32 0.03125, %v57_v7  ;;  %v63_v9 = vmul.f32 %v61_v6, %v61_v6  ;;  %v4919_v7 = vld [vmem:[%s5520_s1 + $0x2] ss:$0 sm:$0xff] }
  0x93   :  { %v62_v10 = vsub.f32 %v48_v1, %v60_v8  ;;  %v65_v11 = vsel %vm51_vm0, %v63_v9, 0.0 }
  0x94   :  { %66 = vadd.xlane.f32.xlu1 %v65_v11 }
  0x95   :  { %v64_v12 = vmul.f32 %v62_v10, %v62_v10 }
  0x97   :  { %v68_v13 = vsel %vm51_vm0, %v64_v12, 0.0 }
  0x98   :  { %69 = vadd.xlane.f32.xlu1 %v68_v13 }
 0x11d   :  { %v67_v18 = vpop.xlane.xlu1 %66 }
 0x11e   :  { %v71_v19 = vmul.f32 0.03125, %v67_v18  ;;  %v4932_v18 = vld [vmem:[%s5520_s1 + $0x5] ss:$0 sm:$0xff] }
 0x120   :  { %v73_v20 = vadd.f32 1e-05, %v71_v19 }
 0x121   :  { %v70_v21 = vpop.xlane.xlu1 %69 }
 0x122   :  { %4583 = vrsqrt.f32 %v73_v20  ;;  %v72_v22 = vmul.f32 0.03125, %v70_v21 }
 0x124   :  { %v74_v23 = vadd.f32 1e-05, %v72_v22 }
 0x126   :  { %4585 = vrsqrt.f32 %v74_v23 }
 0x12f   :  { %v4584_v24 = vpop.eup %4583 }
 0x130   :  { %v77_v26 = vmul.f32 %v4584_v24, %v61_v6  ;;  %v4939_v24 = vld [vmem:[%s5520_s1 + $0x6] ss:$0 sm:$0xff] }
 0x132   :  { %v83_v28 = vmul.f32 %v4014_v25, %v77_v26 }
 0x133   :  { %v4586_v29 = vpop.eup %4585 }
 0x134   :  { %v78_v30 = vmul.f32 %v4586_v29, %v62_v10  ;;  %v4788_v31 = vadd.f32 %v4015_v27, %v83_v28  ;;  %v4945_v29 = vld [vmem:[%s5520_s1 + $0x7] ss:$0 sm:$0xff]  ;;  %s4681_s1 = smov 64  }
 0x136   :  { %v84_v32 = vmul.f32 %v4014_v25, %v78_v30  ;;  %4271 = vmatprep.mubr.msk.f32.mxu0 %vm51_vm0, %v4788_v31 }
 0x138   :  { %v4792_v33 = vadd.f32 %v4015_v27, %v84_v32 }
 0x13a   :  { %4272 = vmatmul.mubr.msk.f32.vlgmr.msra.gmra.mxu0 %vm51_vm0, %v4792_v33 }
 0x13b   :  { %4276 = vmatprep.mubr.msk.f32.mxu0 %vm4676_vm1, %v4675_v35 }
 0x1fa   :  { %v4273_v36 = vpop.f32.mrf.mxu0 }
 0x1fb   :  { %v4801_v37 = vadd.f32 %v4273_v36, %v4016_v34 }
 0x1fc   :  { %v183_v38 = vpop.f32.mrf.mxu0 }
 0x1fd   :  { %v4807_v39 = vadd.f32 %v4016_v34, %v183_v38  ;;  %196 = vrot.lane.b32.xlu1 %v4801_v37, %s4677_s2 }
 0x1ff   :  { %193 = vrot.lane.b32.xlu0 %v4807_v39, %s4677_s2 }
 0x201   :  { %198 = vrot.lane.b32.xlu1 %v4807_v39, %s4678_s30 }
 0x203   :  { %202 = vrot.lane.b32.xlu0 %v4807_v39, %s4679_s15 }
 0x205   :  { %200 = vrot.lane.b32.xlu1 %v4801_v37, %s4678_s30 }
 0x207   :  { %206 = vrot.lane.b32.xlu0 %v4807_v39, %s4680_s16 }
 0x209   :  { %204 = vrot.lane.b32.xlu1 %v4801_v37, %s4679_s15 }
 0x20d   :  { %283 = vrot.lane.b32.xlu1 %v4801_v37, %s4680_s16 }
 0x26f   :  { %v4825_v40 = vpop.permute.xlu1 %196 }
 0x270   :  { %435 = vrot.lane.b32.xlu1 %v4825_v40, %s4680_s16 }
 0x271   :  { %v4829_v41 = vpop.permute.xlu0 %193 }
 0x272   :  { %359 = vrot.lane.b32.xlu0 %v4829_v41, %s4680_s16 }
 0x273   :  { %v4833_v42 = vpop.permute.xlu1 %198 }
 0x275   :  { %v4835_v43 = vpop.permute.xlu0 %202 }
 0x276   :  { %511 = vrot.lane.b32.xlu0 %v4833_v42, %s4680_s16 }
 0x277   :  { %v4839_v44 = vpop.permute.xlu1 %200 }
 0x278   :  { %587 = vrot.lane.b32.xlu1 %v4839_v44, %s4680_s16 }
 0x279   :  { %v207_v45 = vpop.permute.xlu0 %206 }
 0x27a   :  { %663 = vrot.lane.b32.xlu0 %v4835_v43, %s4680_s16  ;;  %4275 = vmatpush3.xpose.msk.msra.mxu0 %vm208_vm2, %v207_v45 }
 0x27b   :  { %v4846_v46 = vpop.permute.xlu1 %204  ;;  %4284 = vmatprep.subr.mxu0 %v4675_v35 }
 0x27c   :  { %739 = vrot.lane.b32.xlu1 %v4846_v46, %s4680_s16 }
 0x27d   :  { %4277 = vmatmul.mubr.msk.f32.vlgmr.msra.gmra.mxu0 %vm208_vm2, %v4807_v39 }
 0x27e   :  { %4286 = vmatprep.mubr.msk.f32.mxu0 %vm4676_vm1, %v4675_v35 }
 0x27f   :  { %v284_v47 = vpop.permute.xlu1 %283 }
 0x280   :  { %4280 = vmatpush3.xpose.msk.msra.mxu1 %vm208_vm2, %v284_v47 }
 0x281   :  { %4289 = vmatprep.subr.mxu1 %v4675_v35 }
 0x283   :  { %4282 = vmatmul.mubr.msk.f32.vlgmr.msra.gmra.mxu1 %vm208_vm2, %v4801_v37 }
 0x284   :  { %4291 = vmatprep.mubr.msk.f32.mxu1 %vm4676_vm1, %v4675_v35 }
 0x2e2   :  { %v436_v48 = vpop.permute.xlu1 %435 }
 0x2e3   :  { %4290 = vmatpush3.xpose.msk.msra.mxu1 %vm208_vm2, %v436_v48 }
 0x2e4   :  { %v360_v49 = vpop.permute.xlu0 %359  ;;  %4299 = vmatprep.subr.mxu1 %v4675_v35 }
 0x2e5   :  { %4285 = vmatpush3.xpose.msk.msra.mxu0 %vm208_vm2, %v360_v49 }
 0x2e6   :  { %4292 = vmatmul.mubr.msk.f32.vlgmr.msra.gmra.mxu1 %vm208_vm2, %v4825_v40  ;;  %4294 = vmatprep.subr.mxu0 %v4675_v35 }
 0x2e7   :  { %4301 = vmatprep.mubr.msk.f32.mxu1 %vm4676_vm1, %v4675_v35 }
 0x2e8   :  { %4287 = vmatmul.mubr.msk.f32.vlgmr.msra.gmra.mxu0 %vm208_vm2, %v4829_v41  ;;  %v512_v50 = vpop.permute.xlu0 %511 }
 0x2e9   :  { %4295 = vmatpush3.xpose.msk.msra.mxu0 %vm208_vm2, %v512_v50  ;;  %4296 = vmatprep.mubr.msk.f32.mxu0 %vm4676_vm1, %v4675_v35 }
 0x2ea   :  { %v588_v51 = vpop.permute.xlu1 %587  ;;  %4304 = vmatprep.subr.mxu0 %v4675_v35 }
 0x2eb   :  { %4300 = vmatpush3.xpose.msk.msra.mxu1 %vm208_vm2, %v588_v51 }
 0x2ec   :  { %4297 = vmatmul.mubr.msk.f32.vlgmr.msra.gmra.mxu0 %vm208_vm2, %v4833_v42  ;;  %v664_v52 = vpop.permute.xlu0 %663  ;;  %4309 = vmatprep.subr.mxu1 %v4675_v35 }
 0x2ed   :  { %4305 = vmatpush3.xpose.msk.msra.mxu0 %vm208_vm2, %v664_v52  ;;  %4306 = vmatprep.mubr.msk.f32.mxu0 %vm4676_vm1, %v4675_v35 }
 0x2ee   :  { %4302 = vmatmul.mubr.msk.f32.vlgmr.msra.gmra.mxu1 %vm208_vm2, %v4839_v44  ;;  %v740_v53 = vpop.permute.xlu1 %739  ;;  %4314 = vmatprep.subr.mxu0 %v4675_v35 }
 0x2ef   :  { %4310 = vmatpush3.xpose.msk.msra.mxu1 %vm208_vm2, %v740_v53  ;;  %4311 = vmatprep.mubr.msk.f32.mxu1 %vm4676_vm1, %v4675_v35 }
 0x2f0   :  { %4307 = vmatmul.mubr.msk.f32.vlgmr.msra.gmra.mxu0 %vm208_vm2, %v4835_v43  ;;  %4319 = vmatprep.subr.mxu1 %v4675_v35 }
 0x2f1   :  { %4316 = vmatprep.mubr.msk.f32.mxu0 %vm4676_vm1, %v4675_v35 }
 0x2f2   :  { %4312 = vmatmul.mubr.msk.f32.vlgmr.msra.gmra.mxu1 %vm208_vm2, %v4846_v46 }
 0x2f3   :  { %4321 = vmatprep.mubr.msk.f32.mxu1 %vm4676_vm1, %v4675_v35 }
 0x33d   :  { %v279_v54 = vpop.f32.mrf.mxu0 }
 0x33e   :  { %v815_v56 = vmul.f32 0.35355338, %v279_v54 }
 0x33f   :  { %v4278_v57 = vpop.f32.mrf.mxu0 }
 0x340   :  { %v871_v58 = vadd.f32 %v4900_v55, %v815_v56 }
 0x342   :  { %v879_v59 = vsel %vm208_vm2, %v871_v58, -inf }
 0x343   :  { %v355_v60 = vpop.f32.mrf.mxu1  ;;  %880 = vmax.xlane.f32.xlu0 %v879_v59 }
 0x344   :  { %v816_v62 = vmul.f32 0.35355338, %v355_v60 }
 0x345   :  { %v4283_v63 = vpop.f32.mrf.mxu1 }
 0x346   :  { %v872_v0 = vadd.f32 %v4907_v61, %v816_v62 }
 0x348   :  { %v882_v1 = vsel %vm208_vm2, %v872_v0, -inf }
 0x349   :  { %883 = vmax.xlane.f32.xlu1 %v882_v1 }
 0x3a6   :  { %v507_v2 = vpop.f32.mrf.mxu1 }
 0x3a7   :  { %v818_v4 = vmul.f32 0.35355338, %v507_v2 }
 0x3a8   :  { %v431_v5 = vpop.f32.mrf.mxu0  ;;  %v4293_v6 = vpop.f32.mrf.mxu1 }
 0x3a9   :  { %v817_v8 = vmul.f32 0.35355338, %v431_v5  ;;  %v874_v9 = vadd.f32 %v4914_v3, %v818_v4 }
 0x3aa   :  { %v4288_v10 = vpop.f32.mrf.mxu0 }
 0x3ab   :  { %v888_v11 = vsel %vm208_vm2, %v874_v9, -inf  ;;  %v873_v12 = vadd.f32 %v4919_v7, %v817_v8 }
 0x3ac   :  { %889 = vmax.xlane.f32.xlu0 %v888_v11  ;;  %v583_v13 = vpop.f32.mrf.mxu0 }
 0x3ad   :  { %v819_v15 = vmul.f32 0.35355338, %v583_v13  ;;  %v885_v20 = vsel %vm208_vm2, %v873_v12, -inf }
 0x3ae   :  { %v4298_v16 = vpop.f32.mrf.mxu0  ;;  %v659_v17 = vpop.f32.mrf.mxu1 }
 0x3af   :  { %v820_v19 = vmul.f32 0.35355338, %v659_v17  ;;  %v875_v21 = vadd.f32 %v4927_v14, %v819_v15 }
 0x3b0   :  { %v4303_v22 = vpop.f32.mrf.mxu1  ;;  %886 = vmax.xlane.f32.xlu0 %v885_v20  ;;  %v735_v23 = vpop.f32.mrf.mxu0 }
 0x3b1   :  { %v821_v25 = vmul.f32 0.35355338, %v735_v23  ;;  %v876_v26 = vadd.f32 %v4932_v18, %v820_v19  ;;  %v891_v34 = vsel %vm208_vm2, %v875_v21, -inf }
 0x3b2   :  { %v4308_v27 = vpop.f32.mrf.mxu0  ;;  %v811_v28 = vpop.f32.mrf.mxu1 }
 0x3b3   :  { %v822_v30 = vmul.f32 0.35355338, %v811_v28  ;;  %v894_v32 = vsel %vm208_vm2, %v876_v26, -inf  ;;  %v877_v36 = vadd.f32 %v4939_v24, %v821_v25 }
 0x3b4   :  { %895 = vmax.xlane.f32.xlu1 %v894_v32  ;;  %v4313_v38 = vpop.f32.mrf.mxu1  ;;  %892 = vmax.xlane.f32.xlu0 %v891_v34 }
 0x3b5   :  { %v878_v45 = vadd.f32 %v4945_v29, %v822_v30  ;;  %v897_v48 = vsel %vm208_vm2, %v877_v36, -inf }
 0x3b7   :  { %v900_v47 = vsel %vm208_vm2, %v878_v45, -inf }
 0x3b8   :  { %901 = vmax.xlane.f32.xlu1 %v900_v47  ;;  %898 = vmax.xlane.f32.xlu0 %v897_v48 }
 0x3c9   :  { %1043 = vrot.lane.b32.xlu1 %v4801_v37, %s4681_s1 }
 0x3cc   :  { %v881_v49 = vpop.xlane.xlu0 %880 }
 0x3cd   :  { %1119 = vrot.lane.b32.xlu1 %v4829_v41, %s4681_s1  ;;  %v903_v50 = vsub.f32 %v871_v58, %v881_v49 }
 0x3ce   :  { %967 = vrot.lane.b32.xlu0 %v4807_v39, %s4681_s1 }
 0x3cf   :  { %v911_v51 = vmul.f32 1.442695, %v903_v50 }
 0x3d1   :  { %1195 = vrot.lane.b32.xlu1 %v4825_v40, %s4681_s1  ;;  %4587 = vpow2.f32 %v911_v51 }
 0x3d2   :  { %1271 = vrot.lane.b32.xlu0 %v4833_v42, %s4681_s1  ;;  %v884_v52 = vpop.xlane.xlu1 %883 }
 0x3d3   :  { %v904_v37 = vsub.f32 %v872_v0, %v884_v52 }
 0x3d5   :  { %1347 = vrot.lane.b32.xlu1 %v4839_v44, %s4681_s1  ;;  %v913_v53 = vmul.f32 1.442695, %v904_v37 }
 0x3d7   :  { %4589 = vpow2.f32 %v913_v53 }
 0x3de   :  { %v4965_v41 = vpop.eup %4587 }
 0x3df   :  { %v927_v39 = vsel %vm208_vm2, %v4965_v41, 0.0 }
 0x3e4   :  { %v4969_v40 = vpop.eup %4589 }
 0x3e5   :  { %v930_v42 = vsel %vm208_vm2, %v4969_v40, 0.0 }
 0x3f1   :  { %928 = vadd.xlane.f32.xlu0 %v927_v39 }
 0x3f9   :  { %931 = vadd.xlane.f32.xlu1 %v930_v42 }
 0x435   :  { %v890_v44 = vpop.xlane.xlu0 %889 }
 0x436   :  { %v906_v54 = vsub.f32 %v874_v9, %v890_v44 }
 0x438   :  { %v917_v56 = vmul.f32 1.442695, %v906_v54 }
 0x439   :  { %v887_v57 = vpop.xlane.xlu0 %886 }
 0x43a   :  { %4591 = vpow2.f32 %v917_v56  ;;  %v905_v58 = vsub.f32 %v873_v12, %v887_v57 }
 0x43c   :  { %v915_v59 = vmul.f32 1.442695, %v905_v58 }
 0x43d   :  { %v896_v60 = vpop.xlane.xlu1 %895  ;;  %v893_v62 = vpop.xlane.xlu0 %892 }
 0x43e   :  { %4593 = vpow2.f32 %v915_v59  ;;  %v908_v63 = vsub.f32 %v876_v26, %v896_v60  ;;  %v907_v0 = vsub.f32 %v875_v21, %v893_v62 }
 0x440   :  { %v921_v1 = vmul.f32 1.442695, %v908_v63  ;;  %v919_v2 = vmul.f32 1.442695, %v907_v0 }
 0x441   :  { %v902_v4 = vpop.xlane.xlu1 %901  ;;  %v899_v5 = vpop.xlane.xlu0 %898 }
 0x442   :  { %4595 = vpow2.f32 %v921_v1  ;;  %v910_v6 = vsub.f32 %v878_v45, %v902_v4  ;;  %v909_v8 = vsub.f32 %v877_v36, %v899_v5  ;;  %v1610_v5 = vld [vmem:[%s5521_s5 + $0x18] sm:$0xff] }
 0x443   :  { %4597 = vpow2.f32 %v919_v2 }
 0x444   :  { %v925_v10 = vmul.f32 1.442695, %v910_v6  ;;  %v923_v9 = vmul.f32 1.442695, %v909_v8  ;;  %v1609_v6 = vld [vmem:[%s5521_s5 + $0x10] sm:$0xff] }
 0x445   :  { %v1044_v11 = vpop.permute.xlu1 %1043  ;;  %v968_v13 = vpop.permute.xlu0 %967 }
 0x446   :  { %4599 = vpow2.f32 %v925_v10  ;;  %4315 = vmatpush3.msra.mxu0 %v968_v13  ;;  %4320 = vmatpush3.msra.mxu1 %v1044_v11  ;;  %v1608_v10 = vld [vmem:[%s5521_s5 + $0x8] sm:$0xff]  ;;  %v1607_v11 = vld [vmem:[%s5521_s5] sm:$0xff] }
 0x447   :  { %v4592_v12 = vpop.eup %4591  ;;  %4601 = vpow2.f32 %v923_v9  ;;  %4324 = vmatprep.subr.mxu0 %v4675_v35  ;;  %4329 = vmatprep.subr.mxu1 %v4675_v35 }
 0x448   :  { %v936_v15 = vsel %vm208_vm2, %v4592_v12, 0.0 }
 0x449   :  { %937 = vadd.xlane.f32.xlu1 %v936_v15  ;;  %v1120_v28 = vpop.permute.xlu1 %1119  ;;  %v1272_v30 = vpop.permute.xlu0 %1271 }
 0x44b   :  { %v4594_v16 = vpop.eup %4593 }
 0x44c   :  { %v933_v17 = vsel %vm208_vm2, %v4594_v16, 0.0 }
 0x44d   :  { %934 = vadd.xlane.f32.xlu0 %v933_v17  ;;  %v1196_v32 = vpop.permute.xlu1 %1195 }
 0x44f   :  { %v4596_v19 = vpop.eup %4595 }
 0x450   :  { %v4598_v20 = vpop.eup %4597  ;;  %v942_v21 = vsel %vm208_vm2, %v4596_v19, 0.0 }
 0x451   :  { %943 = vadd.xlane.f32.xlu1 %v942_v21  ;;  %v939_v22 = vsel %vm208_vm2, %v4598_v20, 0.0  ;;  %v1348_v36 = vpop.permute.xlu1 %1347 }
 0x452   :  { %940 = vadd.xlane.f32.xlu0 %v939_v22 }
 0x453   :  { %v4979_v23 = vpop.eup %4599 }
 0x454   :  { %v4981_v25 = vpop.eup %4601  ;;  %v948_v26 = vsel %vm208_vm2, %v4979_v23, 0.0 }
 0x455   :  { %949 = vadd.xlane.f32.xlu1 %v948_v26  ;;  %v945_v27 = vsel %vm208_vm2, %v4981_v25, 0.0 }
 0x456   :  { %946 = vadd.xlane.f32.xlu0 %v945_v27 }
 0x466   :  { %1499 = vrot.lane.b32.xlu1 %v4846_v46, %s4681_s1 }
 0x46c   :  { %1423 = vrot.lane.b32.xlu0 %v4835_v43, %s4681_s1 }
 0x47a   :  { %v929_v34 = vpop.xlane.xlu0 %928 }
 0x47b   :  { %4603 = vrcp.f32 %v929_v34 }
 0x482   :  { %v932_v38 = vpop.xlane.xlu1 %931 }
 0x483   :  { %4605 = vrcp.f32 %v932_v38 }
 0x488   :  { %v4604_v45 = vpop.eup %4603 }
 0x489   :  { %v959_v47 = vmul.f32 %v4604_v45, %v4965_v41 }
 0x48b   :  { %4317 = vmatmul.mubr.msk.f32.vlgmr.msra.gmra.mxu0 %vm208_vm2, %v959_v47 }
 0x48c   :  { %4325 = vmatpush3.msra.mxu0 %v1120_v28  ;;  %4326 = vmatprep.mubr.msk.f32.mxu0 %vm4676_vm1, %v4675_v35 }
 0x48d   :  { %4334 = vmatprep.subr.mxu0 %v4675_v35 }
 0x490   :  { %v4606_v43 = vpop.eup %4605 }
 0x491   :  { %v960_v46 = vmul.f32 %v4606_v43, %v4969_v40 }
 0x493   :  { %4322 = vmatmul.mubr.msk.f32.vlgmr.msra.gmra.mxu1 %vm208_vm2, %v960_v46  ;;  %v1611_v46 = vlaneseq }
 0x494   :  { %4330 = vmatpush3.msra.mxu1 %v1196_v32  ;;  %4331 = vmatprep.mubr.msk.f32.mxu1 %vm4676_vm1, %v4675_v35 }
 0x495   :  { %4339 = vmatprep.subr.mxu1 %v4675_v35 }
 0x4d2   :  { %v938_v48 = vpop.xlane.xlu1 %937 }
 0x4d3   :  { %4607 = vrcp.f32 %v938_v48  ;;  %v5045_v48 = vshrl.u32 %v1611_v46, 7 }
 0x4d6   :  { %v935_v49 = vpop.xlane.xlu0 %934 }
 0x4d7   :  { %4609 = vrcp.f32 %v935_v49  ;;  %v1613_v49 = vsub.s32 0, %v5045_v48 }
 0x4da   :  { %v944_v50 = vpop.xlane.xlu1 %943 }
 0x4db   :  { %4611 = vrcp.f32 %v944_v50  ;;  %v941_v51 = vpop.xlane.xlu0 %940  ;;  %v5051_v50 = vld [vmem:[%s5522_s9] sm:$0x3f] }
 0x4dc   :  { %4613 = vrcp.f32 %v941_v51  ;;  %v1614_v51 = vrot.slane %v5051_v50, %v1613_v49 }
 0x4de   :  { %v950_v52 = vpop.xlane.xlu1 %949 }
 0x4df   :  { %4615 = vrcp.f32 %v950_v52  ;;  %v947_v37 = vpop.xlane.xlu0 %946 }
 0x4e0   :  { %v4608_v53 = vpop.eup %4607  ;;  %4617 = vrcp.f32 %v947_v37 }
 0x4e1   :  { %v962_v41 = vmul.f32 %v4608_v53, %v4592_v12 }
 0x4e2   :  { %v1500_v57 = vpop.permute.xlu1 %1499 }
 0x4e3   :  { %4332 = vmatmul.mubr.msk.f32.vlgmr.msra.gmra.mxu1 %vm208_vm2, %v962_v41  ;;  %v1424_v59 = vpop.permute.xlu0 %1423 }
 0x4e4   :  { %v4610_v39 = vpop.eup %4609  ;;  %4340 = vmatpush3.msra.mxu1 %v1348_v36  ;;  %4341 = vmatprep.mubr.msk.f32.mxu1 %vm4676_vm1, %v4675_v35 }
 0x4e5   :  { %v961_v40 = vmul.f32 %v4610_v39, %v4594_v16  ;;  %4349 = vmatprep.subr.mxu1 %v4675_v35 }
 0x4e7   :  { %4327 = vmatmul.mubr.msk.f32.vlgmr.msra.gmra.mxu0 %vm208_vm2, %v961_v40 }
 0x4e8   :  { %v4612_v42 = vpop.eup %4611  ;;  %4335 = vmatpush3.msra.mxu0 %v1272_v30  ;;  %4336 = vmatprep.mubr.msk.f32.mxu0 %vm4676_vm1, %v4675_v35 }
 0x4e9   :  { %v4614_v44 = vpop.eup %4613  ;;  %4344 = vmatprep.subr.mxu0 %v4675_v35  ;;  %v964_v54 = vmul.f32 %v4612_v42, %v4596_v19 }
 0x4ea   :  { %v963_v56 = vmul.f32 %v4614_v44, %v4598_v20 }
 0x4eb   :  { %4342 = vmatmul.mubr.msk.f32.vlgmr.msra.gmra.mxu1 %vm208_vm2, %v964_v54 }
 0x4ec   :  { %v4616_v58 = vpop.eup %4615  ;;  %4337 = vmatmul.mubr.msk.f32.vlgmr.msra.gmra.mxu0 %vm208_vm2, %v963_v56  ;;  %4350 = vmatpush3.msra.mxu1 %v1500_v57 }
 0x4ed   :  { %v4618_v60 = vpop.eup %4617  ;;  %4345 = vmatpush3.msra.mxu0 %v1424_v59  ;;  %4346 = vmatprep.mubr.msk.f32.mxu0 %vm4676_vm1, %v4675_v35  ;;  %v966_v62 = vmul.f32 %v4616_v58, %v4979_v23 }
 0x4ee   :  { %4351 = vmatprep.mubr.msk.f32.mxu1 %vm4676_vm1, %v4675_v35  ;;  %v965_v63 = vmul.f32 %v4618_v60, %v4981_v25  ;;  %4354 = vmatprep.subr.mxu0 %v1610_v5 }
 0x4ef   :  { %4352 = vmatmul.mubr.msk.f32.vlgmr.msra.gmra.mxu1 %vm208_vm2, %v966_v62 }
 0x4f0   :  { %4347 = vmatmul.mubr.msk.f32.vlgmr.msra.gmra.mxu0 %vm208_vm2, %v965_v63 }
 0x4f1   :  { %4355 = vmatpush3.msra.mxu0 %v1610_v5 }
 0x4f2   :  { %4356 = vmatprep.subr.mxu0 %v1609_v6 }
 0x4f3   :  { %4357 = vmatpush3.msra.mxu0 %v1609_v6 }
 0x4f4   :  { %4358 = vmatprep.subr.mxu0 %v1608_v10 }
 0x4f5   :  { %4359 = vmatpush3.msra.mxu0 %v1608_v10 }
 0x4f6   :  { %4360 = vmatprep.subr.mxu0 %v1607_v11 }
 0x4f7   :  { %4361 = vmatpush3.msra.mxu0 %v1607_v11 }
 0x54b   :  { %v1039_v0 = vpop.f32.mrf.mxu0 }
 0x54d   :  { %v4318_v1 = vpop.f32.mrf.mxu0 }
 0x54e   :  { %v1738_v1 = vld [vmem:[%s5523_s6 + $0x10] sm:$0xff] }
 0x553   :  { %v1115_v2 = vpop.f32.mrf.mxu1 }
 0x555   :  { %v4323_v4 = vpop.f32.mrf.mxu1 }
 0x556   :  { %v1736_v4 = vld [vmem:[%s5523_s6] sm:$0xff] }
 0x5a3   :  { %v1267_v8 = vpop.f32.mrf.mxu1 }
 0x5a4   :  { %1593 = vrot.lane.b32.xlu0 %v1267_v8, %s4682_s22 }
 0x5a5   :  { %v4333_v9 = vpop.f32.mrf.mxu1 }
 0x5a7   :  { %v1191_v13 = vpop.f32.mrf.mxu0 }
 0x5a8   :  { %1576 = vrot.lane.b32.xlu0 %v1191_v13, %s4682_s22  ;;  %v1726_v13 = vsub.s32 1, %v5045_v48 }
 0x5a9   :  { %v4328_v12 = vpop.f32.mrf.mxu0 }
 0x5aa   :  { %v1732_v12 = vsub.s32 2, %v5045_v48 }
 0x5ab   :  { %v1419_v15 = vpop.f32.mrf.mxu1 }
 0x5ac   :  { %v1343_v16 = vpop.f32.mrf.mxu0  ;;  %1597 = vrot.lane.b32.xlu0 %v1419_v15, %s4683_s27  ;;  %v1727_v15 = vrot.slane %v5051_v50, %v1726_v13 }
 0x5ad   :  { %1580 = vrot.lane.b32.xlu1 %v1343_v16, %s4683_s27  ;;  %v4343_v17 = vpop.f32.mrf.mxu1 }
 0x5ae   :  { %v4338_v19 = vpop.f32.mrf.mxu0 }
 0x5af   :  { %v1571_v20 = vpop.f32.mrf.mxu1  ;;  %v1733_v19 = vrot.slane %v5051_v50, %v1732_v12 }
 0x5b0   :  { %v1495_v21 = vpop.f32.mrf.mxu0 }
 0x5b1   :  { %1584 = vrot.lane.b32.xlu1 %v1495_v21, %s4684_s28  ;;  %v4353_v22 = vpop.f32.mrf.mxu1 }
 0x5b2   :  { %v4348_v23 = vpop.f32.mrf.mxu0 }
 0x5b5   :  { %1601 = vrot.lane.b32.xlu1 %v1571_v20, %s4684_s28 }
 0x616   :  { %v1594_v25 = vpop.permute.xlu0 %1593 }
 0x617   :  { %v1604_v38 = vsel %vm208_vm2, %v1115_v2, %v1594_v25  ;;  %v1737_v2 = vld [vmem:[%s5523_s6 + $0x8] sm:$0xff] }
 0x61a   :  { %v1577_v26 = vpop.permute.xlu0 %1576 }
 0x61b   :  { %v1587_v28 = vsel %vm208_vm2, %v1039_v0, %v1577_v26 }
 0x61e   :  { %v1598_v34 = vpop.permute.xlu0 %1597 }
 0x61f   :  { %v1581_v27 = vpop.permute.xlu1 %1580  ;;  %v1605_v45 = vsel %vm1588_vm3, %v1604_v38, %v1598_v34  ;;  %v1849_v34 = vld [vmem:[%s5524_s8 + $0x18] sm:$0xff]  ;;  %v1847_v38 = vld [vmem:[%s5524_s8 + $0x8] sm:$0xff] }
 0x620   :  { %v1589_v30 = vsel %vm1588_vm3, %v1587_v28, %v1581_v27  ;;  %v1853_v27 = vld [vmem:[%s5524_s8 + $0x38] sm:$0xff]  ;;  %v1852_v28 = vld [vmem:[%s5524_s8 + $0x30] sm:$0xff] }
 0x623   :  { %v1585_v32 = vpop.permute.xlu1 %1584 }
 0x624   :  { %v1591_v36 = vsel %vm1590_vm4, %v1589_v30, %v1585_v32  ;;  %v1851_v30 = vld [vmem:[%s5524_s8 + $0x28] sm:$0xff]  ;;  %v1850_v32 = vld [vmem:[%s5524_s8 + $0x20] sm:$0xff] }
 0x625   :  { %4362 = vmatprep.mubr.msk.f32.mxu0 %vm51_vm0, %v1591_v36  ;;  %v1848_v36 = vld [vmem:[%s5524_s8 + $0x10] sm:$0xff] }
 0x627   :  { %v1602_v47 = vpop.permute.xlu1 %1601 }
 0x628   :  { %v1606_v43 = vsel %vm1590_vm4, %v1605_v45, %v1602_v47  ;;  %v1846_v45 = vld [vmem:[%s5524_s8] sm:$0xff] }
 0x629   :  { %4363 = vmatmul.mubr.msk.f32.vlgmr.msra.gmra.mxu0 %vm51_vm0, %v1606_v43  ;;  %v4053_v47 = vld [vmem:[%s5525_s7] ss:$0 sm:$0xff] }
 0x6e9   :  { %v4364_v52 = vpop.f32.mrf.mxu0 }
 0x6ea   :  { %v1693_v37 = vadd.f32 %v4364_v52, %v1614_v51 }
 0x6eb   :  { %v1687_v53 = vpop.f32.mrf.mxu0 }
 0x6ec   :  { %v1688_v41 = vadd.f32 %v1687_v53, %v1614_v51  ;;  %v1697_v39 = vadd.f32 %v1693_v37, %v4792_v33 }
 0x6ee   :  { %v1701_v40 = vsel %vm51_vm0, %v1697_v39, 0.0  ;;  %v1696_v42 = vadd.f32 %v1688_v41, %v4788_v31  ;;  %v1739_v31 = vld [vmem:[%s5523_s6 + $0x18] sm:$0xff] }
 0x6ef   :  { %1702 = vadd.xlane.f32.xlu1 %v1701_v40  ;;  %4365 = vmatprep.subr.mxu0 %v1739_v31 }
 0x6f0   :  { %v1698_v44 = vsel %vm51_vm0, %v1696_v42, 0.0  ;;  %4366 = vmatpush3.msra.mxu0 %v1739_v31 }
 0x6f1   :  { %1699 = vadd.xlane.f32.xlu0 %v1698_v44  ;;  %4367 = vmatprep.subr.mxu0 %v1738_v1 }
 0x6f2   :  { %4368 = vmatpush3.msra.mxu0 %v1738_v1  ;;  %v1856_v1 = vsub.s32 3, %v5045_v48 }
 0x6f3   :  { %4369 = vmatprep.subr.mxu0 %v1737_v2 }
 0x6f4   :  { %4370 = vmatpush3.msra.mxu0 %v1737_v2  ;;  %v1857_v2 = vrot.slane %v5051_v50, %v1856_v1 }
 0x6f5   :  { %4371 = vmatprep.subr.mxu0 %v1736_v4 }
 0x6f6   :  { %4372 = vmatpush3.msra.mxu0 %v1736_v4 }
 0x6f7   :  { %4376 = vmatprep.subr.mxu0 %v1853_v27 }
 0x778   :  { %v1703_v54 = vpop.xlane.xlu1 %1702 }
 0x779   :  { %v1705_v56 = vmul.f32 0.03125, %v1703_v54 }
 0x77a   :  { %v1700_v57 = vpop.xlane.xlu0 %1699 }
 0x77b   :  { %v1704_v58 = vmul.f32 0.03125, %v1700_v57  ;;  %v1707_v59 = vsub.f32 %v1697_v39, %v1705_v56 }
 0x77d   :  { %v1706_v60 = vsub.f32 %v1696_v42, %v1704_v58  ;;  %v1709_v0 = vmul.f32 %v1707_v59, %v1707_v59 }
 0x77f   :  { %v1708_v62 = vmul.f32 %v1706_v60, %v1706_v60  ;;  %v1713_v33 = vsel %vm51_vm0, %v1709_v0, 0.0 }
 0x781   :  { %v1710_v63 = vsel %vm51_vm0, %v1708_v62, 0.0 }
 0x782   :  { %1711 = vadd.xlane.f32.xlu0 %v1710_v63 }
 0x786   :  { %1714 = vadd.xlane.f32.xlu0 %v1713_v33 }
 0x80b   :  { %v1712_v5 = vpop.xlane.xlu0 %1711 }
 0x80c   :  { %v1716_v6 = vmul.f32 0.03125, %v1712_v5 }
 0x80e   :  { %v1718_v8 = vadd.f32 1e-05, %v1716_v6 }
 0x80f   :  { %v1715_v10 = vpop.xlane.xlu0 %1714 }
 0x810   :  { %4619 = vrsqrt.f32 %v1718_v8  ;;  %v1717_v9 = vmul.f32 0.03125, %v1715_v10 }
 0x812   :  { %v1719_v11 = vadd.f32 1e-05, %v1717_v9 }
 0x814   :  { %4621 = vrsqrt.f32 %v1719_v11 }
 0x81d   :  { %v4620_v16 = vpop.eup %4619 }
 0x81e   :  { %v1722_v17 = vmul.f32 %v4620_v16, %v1706_v60 }
 0x820   :  { %v1728_v20 = vmul.f32 %v1727_v15, %v1722_v17 }
 0x821   :  { %v4622_v21 = vpop.eup %4621 }
 0x822   :  { %v1723_v22 = vmul.f32 %v4622_v21, %v1707_v59  ;;  %v5082_v23 = vadd.f32 %v1733_v19, %v1728_v20 }
 0x824   :  { %v1729_v25 = vmul.f32 %v1727_v15, %v1723_v22  ;;  %4373 = vmatprep.mubr.msk.f32.mxu0 %vm51_vm0, %v5082_v23 }
 0x826   :  { %v5086_v26 = vadd.f32 %v1733_v19, %v1729_v25 }
 0x828   :  { %4374 = vmatmul.mubr.msk.f32.vlgmr.msra.gmra.mxu0 %vm51_vm0, %v5086_v26 }
 0x829   :  { %4377 = vmatpush3.msra.mxu0 %v1853_v27 }
 0x82a   :  { %4378 = vmatprep.subr.mxu0 %v1852_v28 }
 0x82b   :  { %4379 = vmatpush3.msra.mxu0 %v1852_v28 }
 0x82c   :  { %4380 = vmatprep.subr.mxu0 %v1851_v30 }
 0x82d   :  { %4381 = vmatpush3.msra.mxu0 %v1851_v30  ;;  %v4061_v30 = vld [vmem:[%s5517_s3 + $0x30] sm:$0xff] }
 0x82e   :  { %4382 = vmatprep.subr.mxu0 %v1850_v32 }
 0x82f   :  { %4383 = vmatpush3.msra.mxu0 %v1850_v32  ;;  %v4060_v32 = vld [vmem:[%s5517_s3 + $0x28] sm:$0xff] }
 0x830   :  { %4384 = vmatprep.subr.mxu0 %v1849_v34 }
 0x831   :  { %4385 = vmatpush3.msra.mxu0 %v1849_v34  ;;  %v4059_v34 = vld [vmem:[%s5517_s3 + $0x20] sm:$0xff] }
 0x832   :  { %4386 = vmatprep.subr.mxu0 %v1848_v36 }
 0x833   :  { %4387 = vmatpush3.msra.mxu0 %v1848_v36 }
 0x834   :  { %4388 = vmatprep.subr.mxu0 %v1847_v38 }
 0x835   :  { %4389 = vmatpush3.msra.mxu0 %v1847_v38 }
 0x836   :  { %4390 = vmatprep.subr.mxu0 %v1846_v45 }
 0x837   :  { %4391 = vmatpush3.msra.mxu0 %v1846_v45 }
 0x838   :  { %4416 = vmatprep.subr.mxu0 %v4675_v35 }
 0x8e8   :  { %v4375_v43 = vpop.f32.mrf.mxu0 }
 0x8e9   :  { %v1825_v46 = vadd.f32 %v4375_v43, %v4053_v47 }
 0x8ea   :  { %v1819_v51 = vpop.f32.mrf.mxu0 }
 0x8eb   :  { %v1829_v52 = vmul.f32 %v1825_v46, %v1825_v46  ;;  %v1820_v37 = vadd.f32 %v4053_v47, %v1819_v51  ;;  %v1970_v51 = vsub.s32 4, %v5045_v48 }
 0x8ed   :  { %v1831_v53 = vmul.f32 %v1829_v52, %v1825_v46  ;;  %v1828_v41 = vmul.f32 %v1820_v37, %v1820_v37 }
 0x8ef   :  { %v1833_v39 = vmul.f32 0.044715, %v1831_v53  ;;  %v1830_v40 = vmul.f32 %v1828_v41, %v1820_v37  ;;  %v1976_v53 = vsub.s32 5, %v5045_v48  ;;  %v3922_v48 = vld [vmem:[%s5527_s12 + $0x60] sm:$0xff] }
 0x8f1   :  { %v1835_v42 = vadd.f32 %v1833_v39, %v1825_v46  ;;  %v1832_v44 = vmul.f32 0.044715, %v1830_v40 }
 0x8f3   :  { %v1837_v54 = vmul.f32 0.7978846, %v1835_v42  ;;  %v1834_v56 = vadd.f32 %v1832_v44, %v1820_v37  ;;  %v1977_v44 = vrot.slane %v5051_v50, %v1976_v53 }
 0x8f5   :  { %4623 = vtanh.f32 %v1837_v54  ;;  %v1836_v57 = vmul.f32 0.7978846, %v1834_v56 }
 0x8f7   :  { %4625 = vtanh.f32 %v1836_v57 }
 0x902   :  { %v4624_v58 = vpop.eup %4623 }
 0x903   :  { %v1841_v59 = vadd.f32 1.0, %v4624_v58  ;;  %v4064_v58 = vld [vmem:[%s5519_s4 + $0x1] ss:$0 sm:$0xff] }
 0x904   :  { %v4626_v60 = vpop.eup %4625 }
 0x905   :  { %v1840_v62 = vadd.f32 1.0, %v4626_v60  ;;  %v1843_v63 = vmul.f32 0.5, %v1841_v59 }
 0x907   :  { %v1842_v0 = vmul.f32 0.5, %v1840_v62  ;;  %v1845_v31 = vmul.f32 %v1843_v63, %v1825_v46 }
 0x909   :  { %v1844_v33 = vmul.f32 %v1842_v0, %v1820_v37  ;;  %v1971_v37 = vrot.slane %v5051_v50, %v1970_v51 }
 0x90b   :  { %4392 = vmatprep.mubr.msk.f32.mxu0 %vm1858_vm5, %v1844_v33 }
 0x90c   :  { %4393 = vmatmul.mubr.msk.f32.vlgmr.msra.gmra.mxu0 %vm1858_vm5, %v1845_v31 }
 0x90d   :  { %4418 = vmatprep.mubr.msk.f32.mxu0 %vm4676_vm1, %v4675_v35 }
 0x9cc   :  { %v4394_v4 = vpop.f32.mrf.mxu0 }
 0x9cd   :  { %v1937_v5 = vadd.f32 %v4394_v4, %v1857_v2 }
 0x9ce   :  { %v1931_v6 = vpop.f32.mrf.mxu0 }
 0x9cf   :  { %v1932_v8 = vadd.f32 %v1931_v6, %v1857_v2  ;;  %v1941_v10 = vadd.f32 %v1937_v5, %v5086_v26 }
 0x9d1   :  { %v1945_v9 = vsel %vm51_vm0, %v1941_v10, 0.0  ;;  %v1940_v11 = vadd.f32 %v1932_v8, %v5082_v23  ;;  %v4062_v23 = vld [vmem:[%s5517_s3 + $0x38] sm:$0xff] }
 0x9d2   :  { %1946 = vadd.xlane.f32.xlu1 %v1945_v9  ;;  %4395 = vmatprep.subr.mxu1 %v4062_v23 }
 0x9d3   :  { %v1942_v15 = vsel %vm51_vm0, %v1940_v11, 0.0  ;;  %4396 = vmatpush3.msra.mxu1 %v4062_v23 }
 0x9d4   :  { %1943 = vadd.xlane.f32.xlu0 %v1942_v15  ;;  %4397 = vmatprep.subr.mxu1 %v4061_v30 }
 0x9d5   :  { %4398 = vmatpush3.msra.mxu1 %v4061_v30 }
 0x9d6   :  { %4399 = vmatprep.subr.mxu1 %v4060_v32 }
 0x9d7   :  { %4400 = vmatpush3.msra.mxu1 %v4060_v32 }
 0x9d8   :  { %4401 = vmatprep.subr.mxu1 %v4059_v34 }
 0x9d9   :  { %4402 = vmatpush3.msra.mxu1 %v4059_v34 }
 0x9da   :  { %4406 = vmatprep.subr.mxu1 %v4675_v35 }
 0xa5b   :  { %v1947_v16 = vpop.xlane.xlu1 %1946 }
 0xa5c   :  { %v1949_v17 = vmul.f32 0.03125, %v1947_v16 }
 0xa5d   :  { %v1944_v19 = vpop.xlane.xlu0 %1943 }
 0xa5e   :  { %v1951_v20 = vsub.f32 %v1941_v10, %v1949_v17  ;;  %v1948_v21 = vmul.f32 0.03125, %v1944_v19 }
 0xa60   :  { %v1950_v22 = vsub.f32 %v1940_v11, %v1948_v21  ;;  %v1953_v25 = vmul.f32 %v1951_v20, %v1951_v20 }
 0xa62   :  { %v1957_v27 = vsel %vm51_vm0, %v1953_v25, 0.0  ;;  %v1952_v28 = vmul.f32 %v1950_v22, %v1950_v22 }
 0xa63   :  { %1958 = vadd.xlane.f32.xlu1 %v1957_v27 }
 0xa64   :  { %v1954_v26 = vsel %vm51_vm0, %v1952_v28, 0.0 }
 0xa65   :  { %1955 = vadd.xlane.f32.xlu0 %v1954_v26 }
 0xaec   :  { %v1959_v36 = vpop.xlane.xlu1 %1958 }
 0xaed   :  { %v1961_v38 = vmul.f32 0.03125, %v1959_v36 }
 0xaee   :  { %v1956_v45 = vpop.xlane.xlu0 %1955 }
 0xaef   :  { %v1963_v47 = vadd.f32 1e-05, %v1961_v38  ;;  %v1960_v43 = vmul.f32 0.03125, %v1956_v45 }
 0xaf1   :  { %4627 = vrsqrt.f32 %v1963_v47  ;;  %v1962_v46 = vadd.f32 1e-05, %v1960_v43 }
 0xaf3   :  { %4629 = vrsqrt.f32 %v1962_v46 }
 0xafe   :  { %v4628_v52 = vpop.eup %4627 }
 0xaff   :  { %v1967_v41 = vmul.f32 %v4628_v52, %v1951_v20 }
 0xb00   :  { %v4630_v39 = vpop.eup %4629 }
 0xb01   :  { %v1966_v40 = vmul.f32 %v4630_v39, %v1950_v22  ;;  %v1973_v42 = vmul.f32 %v1971_v37, %v1967_v41 }
 0xb03   :  { %v1972_v54 = vmul.f32 %v1971_v37, %v1966_v40  ;;  %v5155_v57 = vadd.f32 %v1977_v44, %v1973_v42 }
 0xb05   :  { %v5153_v56 = vadd.f32 %v1977_v44, %v1972_v54 }
 0xb07   :  { %4403 = vmatprep.mubr.msk.f32.mxu1 %vm51_vm0, %v5153_v56 }
 0xb08   :  { %4404 = vmatmul.mubr.msk.f32.vlgmr.msra.gmra.mxu1 %vm51_vm0, %v5155_v57 }
 0xb09   :  { %4408 = vmatprep.mubr.msk.f32.mxu1 %vm4676_vm1, %v4675_v35 }
 0xbc8   :  { %v4405_v59 = vpop.f32.mrf.mxu1 }
 0xbc9   :  { %v5166_v50 = vadd.f32 %v4405_v59, %v4064_v58 }
 0xbca   :  { %v2067_v60 = vpop.f32.mrf.mxu1 }
 0xbcb   :  { %v5168_v62 = vadd.f32 %v4064_v58, %v2067_v60  ;;  %2080 = vrot.lane.b32.xlu1 %v5166_v50, %s4677_s2 }
 0xbcd   :  { %2077 = vrot.lane.b32.xlu0 %v5168_v62, %s4677_s2 }
 0xbcf   :  { %2082 = vrot.lane.b32.xlu1 %v5168_v62, %s4678_s30 }
 0xbd1   :  { %2086 = vrot.lane.b32.xlu0 %v5168_v62, %s4679_s15 }
 0xbd3   :  { %2084 = vrot.lane.b32.xlu1 %v5166_v50, %s4678_s30 }
 0xbd5   :  { %2090 = vrot.lane.b32.xlu0 %v5168_v62, %s4680_s16 }
 0xbd7   :  { %2088 = vrot.lane.b32.xlu1 %v5166_v50, %s4679_s15 }
 0xbdb   :  { %2166 = vrot.lane.b32.xlu1 %v5166_v50, %s4680_s16 }
 0xc3d   :  { %v5186_v63 = vpop.permute.xlu1 %2080 }
 0xc3e   :  { %2318 = vrot.lane.b32.xlu1 %v5186_v63, %s4680_s16 }
 0xc3f   :  { %v5190_v0 = vpop.permute.xlu0 %2077 }
 0xc40   :  { %2242 = vrot.lane.b32.xlu0 %v5190_v0, %s4680_s16 }
 0xc41   :  { %v5194_v33 = vpop.permute.xlu1 %2082 }
 0xc43   :  { %v5196_v31 = vpop.permute.xlu0 %2086 }
 0xc44   :  { %2394 = vrot.lane.b32.xlu0 %v5194_v33, %s4680_s16 }
 0xc45   :  { %v5200_v2 = vpop.permute.xlu1 %2084 }
 0xc46   :  { %2470 = vrot.lane.b32.xlu1 %v5200_v2, %s4680_s16 }
 0xc47   :  { %v2091_v4 = vpop.permute.xlu0 %2090 }
 0xc48   :  { %2546 = vrot.lane.b32.xlu0 %v5196_v31, %s4680_s16  ;;  %4407 = vmatpush3.xpose.msk.msra.mxu1 %vm208_vm2, %v2091_v4 }
 0xc49   :  { %v5207_v5 = vpop.permute.xlu1 %2088  ;;  %4411 = vmatprep.subr.mxu1 %v4675_v35 }
 0xc4a   :  { %2622 = vrot.lane.b32.xlu1 %v5207_v5, %s4680_s16 }
 0xc4b   :  { %4409 = vmatmul.mubr.msk.f32.vlgmr.msra.gmra.mxu1 %vm208_vm2, %v5168_v62 }
 0xc4c   :  { %4413 = vmatprep.mubr.msk.f32.mxu1 %vm4676_vm1, %v4675_v35 }
 0xc4d   :  { %v2167_v6 = vpop.permute.xlu1 %2166 }
 0xc4e   :  { %4412 = vmatpush3.xpose.msk.msra.mxu1 %vm208_vm2, %v2167_v6 }
 0xc4f   :  { %4421 = vmatprep.subr.mxu1 %v4675_v35 }
 0xc51   :  { %4414 = vmatmul.mubr.msk.f32.vlgmr.msra.gmra.mxu1 %vm208_vm2, %v5166_v50 }
 0xc52   :  { %4423 = vmatprep.mubr.msk.f32.mxu1 %vm4676_vm1, %v4675_v35 }
 0xcb0   :  { %v2319_v8 = vpop.permute.xlu1 %2318 }
 0xcb1   :  { %4422 = vmatpush3.xpose.msk.msra.mxu1 %vm208_vm2, %v2319_v8 }
 0xcb2   :  { %v2243_v10 = vpop.permute.xlu0 %2242  ;;  %4431 = vmatprep.subr.mxu1 %v4675_v35 }
 0xcb3   :  { %4417 = vmatpush3.xpose.msk.msra.mxu0 %vm208_vm2, %v2243_v10 }
 0xcb4   :  { %4424 = vmatmul.mubr.msk.f32.vlgmr.msra.gmra.mxu1 %vm208_vm2, %v5186_v63  ;;  %4426 = vmatprep.subr.mxu0 %v4675_v35 }
 0xcb5   :  { %4433 = vmatprep.mubr.msk.f32.mxu1 %vm4676_vm1, %v4675_v35 }
 0xcb6   :  { %4419 = vmatmul.mubr.msk.f32.vlgmr.msra.gmra.mxu0 %vm208_vm2, %v5190_v0  ;;  %v2395_v9 = vpop.permute.xlu0 %2394 }
 0xcb7   :  { %4427 = vmatpush3.xpose.msk.msra.mxu0 %vm208_vm2, %v2395_v9  ;;  %4428 = vmatprep.mubr.msk.f32.mxu0 %vm4676_vm1, %v4675_v35 }
 0xcb8   :  { %v2471_v11 = vpop.permute.xlu1 %2470  ;;  %4436 = vmatprep.subr.mxu0 %v4675_v35 }
 0xcb9   :  { %4432 = vmatpush3.xpose.msk.msra.mxu1 %vm208_vm2, %v2471_v11 }
 0xcba   :  { %4429 = vmatmul.mubr.msk.f32.vlgmr.msra.gmra.mxu0 %vm208_vm2, %v5194_v33  ;;  %v2547_v15 = vpop.permute.xlu0 %2546  ;;  %4441 = vmatprep.subr.mxu1 %v4675_v35 }
 0xcbb   :  { %4437 = vmatpush3.xpose.msk.msra.mxu0 %vm208_vm2, %v2547_v15  ;;  %4438 = vmatprep.mubr.msk.f32.mxu0 %vm4676_vm1, %v4675_v35 }
 0xcbc   :  { %v2623_v16 = vpop.permute.xlu1 %2622  ;;  %4434 = vmatmul.mubr.msk.f32.vlgmr.msra.gmra.mxu1 %vm208_vm2, %v5200_v2  ;;  %4446 = vmatprep.subr.mxu0 %v4675_v35 }
 0xcbd   :  { %4442 = vmatpush3.xpose.msk.msra.mxu1 %vm208_vm2, %v2623_v16  ;;  %4443 = vmatprep.mubr.msk.f32.mxu1 %vm4676_vm1, %v4675_v35 }
 0xcbe   :  { %4439 = vmatmul.mubr.msk.f32.vlgmr.msra.gmra.mxu0 %vm208_vm2, %v5196_v31  ;;  %4451 = vmatprep.subr.mxu1 %v4675_v35 }
 0xcbf   :  { %4448 = vmatprep.mubr.msk.f32.mxu0 %vm4676_vm1, %v4675_v35 }
 0xcc0   :  { %4444 = vmatmul.mubr.msk.f32.vlgmr.msra.gmra.mxu1 %vm208_vm2, %v5207_v5 }
 0xcc1   :  { %4453 = vmatprep.mubr.msk.f32.mxu1 %vm4676_vm1, %v4675_v35 }
 0xd0b   :  { %v2162_v17 = vpop.f32.mrf.mxu1 }
 0xd0c   :  { %v2698_v19 = vmul.f32 0.35355338, %v2162_v17 }
 0xd0d   :  { %v4410_v20 = vpop.f32.mrf.mxu1 }
 0xd0e   :  { %v2706_v21 = vadd.f32 %v4900_v55, %v2698_v19 }
 0xd10   :  { %v2714_v22 = vsel %vm208_vm2, %v2706_v21, -inf }
 0xd11   :  { %2715 = vmax.xlane.f32.xlu0 %v2714_v22  ;;  %v2238_v25 = vpop.f32.mrf.mxu1 }
 0xd12   :  { %v2699_v27 = vmul.f32 0.35355338, %v2238_v25 }
 0xd13   :  { %v4415_v28 = vpop.f32.mrf.mxu1 }
 0xd14   :  { %v2707_v26 = vadd.f32 %v4907_v61, %v2699_v27 }
 0xd16   :  { %v2717_v23 = vsel %vm208_vm2, %v2707_v26, -inf }
 0xd17   :  { %2718 = vmax.xlane.f32.xlu1 %v2717_v23 }
 0xd74   :  { %v2390_v30 = vpop.f32.mrf.mxu1 }
 0xd75   :  { %v2701_v32 = vmul.f32 0.35355338, %v2390_v30 }
 0xd76   :  { %v2314_v34 = vpop.f32.mrf.mxu0  ;;  %v4425_v36 = vpop.f32.mrf.mxu1 }
 0xd77   :  { %v2700_v38 = vmul.f32 0.35355338, %v2314_v34  ;;  %v2709_v45 = vadd.f32 %v4914_v3, %v2701_v32 }
 0xd78   :  { %v4420_v47 = vpop.f32.mrf.mxu0 }
 0xd79   :  { %v2723_v55 = vsel %vm208_vm2, %v2709_v45, -inf  ;;  %v2708_v43 = vadd.f32 %v4919_v7, %v2700_v38 }
 0xd7a   :  { %2724 = vmax.xlane.f32.xlu0 %v2723_v55  ;;  %v2466_v46 = vpop.f32.mrf.mxu0 }
 0xd7b   :  { %v2702_v52 = vmul.f32 0.35355338, %v2466_v46  ;;  %v2720_v39 = vsel %vm208_vm2, %v2708_v43, -inf }
 0xd7c   :  { %v4430_v37 = vpop.f32.mrf.mxu0  ;;  %v2542_v61 = vpop.f32.mrf.mxu1 }
 0xd7d   :  { %v2703_v41 = vmul.f32 0.35355338, %v2542_v61  ;;  %v2710_v40 = vadd.f32 %v4927_v14, %v2702_v52 }
 0xd7e   :  { %v4435_v42 = vpop.f32.mrf.mxu1  ;;  %2721 = vmax.xlane.f32.xlu0 %v2720_v39  ;;  %v2618_v44 = vpop.f32.mrf.mxu0 }
 0xd7f   :  { %v2704_v54 = vmul.f32 0.35355338, %v2618_v44  ;;  %v2711_v3 = vadd.f32 %v4932_v18, %v2703_v41  ;;  %v2726_v4 = vsel %vm208_vm2, %v2710_v40, -inf }
 0xd80   :  { %v4440_v58 = vpop.f32.mrf.mxu0  ;;  %v2694_v59 = vpop.f32.mrf.mxu1 }
 0xd81   :  { %v2705_v60 = vmul.f32 0.35355338, %v2694_v59  ;;  %v2729_v7 = vsel %vm208_vm2, %v2711_v3, -inf  ;;  %v2712_v6 = vadd.f32 %v4939_v24, %v2704_v54 }
 0xd82   :  { %2730 = vmax.xlane.f32.xlu1 %v2729_v7  ;;  %v4445_v8 = vpop.f32.mrf.mxu1  ;;  %2727 = vmax.xlane.f32.xlu0 %v2726_v4 }
 0xd83   :  { %v2713_v14 = vadd.f32 %v4945_v29, %v2705_v60  ;;  %v2732_v9 = vsel %vm208_vm2, %v2712_v6, -inf }
 0xd85   :  { %v2735_v10 = vsel %vm208_vm2, %v2713_v14, -inf }
 0xd86   :  { %2736 = vmax.xlane.f32.xlu1 %v2735_v10  ;;  %2733 = vmax.xlane.f32.xlu0 %v2732_v9 }
 0xd97   :  { %2878 = vrot.lane.b32.xlu1 %v5166_v50, %s4681_s1 }
 0xd9a   :  { %v2716_v18 = vpop.xlane.xlu0 %2715 }
 0xd9b   :  { %2954 = vrot.lane.b32.xlu1 %v5190_v0, %s4681_s1  ;;  %v2738_v24 = vsub.f32 %v2706_v21, %v2716_v18 }
 0xd9c   :  { %2802 = vrot.lane.b32.xlu0 %v5168_v62, %s4681_s1 }
 0xd9d   :  { %v2746_v29 = vmul.f32 1.442695, %v2738_v24 }
 0xd9f   :  { %3030 = vrot.lane.b32.xlu1 %v5186_v63, %s4681_s1  ;;  %4631 = vpow2.f32 %v2746_v29 }
 0xda0   :  { %3106 = vrot.lane.b32.xlu0 %v5194_v33, %s4681_s1  ;;  %v2719_v11 = vpop.xlane.xlu1 %2718 }
 0xda1   :  { %v2739_v50 = vsub.f32 %v2707_v26, %v2719_v11 }
 0xda3   :  { %3182 = vrot.lane.b32.xlu1 %v5200_v2, %s4681_s1  ;;  %v2748_v15 = vmul.f32 1.442695, %v2739_v50 }
 0xda5   :  { %4633 = vpow2.f32 %v2748_v15 }
 0xdac   :  { %v5286_v0 = vpop.eup %4631 }
 0xdad   :  { %v2762_v62 = vsel %vm208_vm2, %v5286_v0, 0.0 }
 0xdb2   :  { %v5290_v63 = vpop.eup %4633 }
 0xdb3   :  { %v2765_v33 = vsel %vm208_vm2, %v5290_v63, 0.0 }
 0xdbf   :  { %2763 = vadd.xlane.f32.xlu0 %v2762_v62 }
 0xdc7   :  { %2766 = vadd.xlane.f32.xlu1 %v2765_v33 }
 0xe03   :  { %v2725_v2 = vpop.xlane.xlu0 %2724 }
 0xe04   :  { %v2741_v16 = vsub.f32 %v2709_v45, %v2725_v2 }
 0xe06   :  { %v2752_v17 = vmul.f32 1.442695, %v2741_v16 }
 0xe07   :  { %v2722_v19 = vpop.xlane.xlu0 %2721 }
 0xe08   :  { %4635 = vpow2.f32 %v2752_v17  ;;  %v2740_v20 = vsub.f32 %v2708_v43, %v2722_v19 }
 0xe0a   :  { %v2750_v21 = vmul.f32 1.442695, %v2740_v20 }
 0xe0b   :  { %v2731_v22 = vpop.xlane.xlu1 %2730  ;;  %v2728_v25 = vpop.xlane.xlu0 %2727 }
 0xe0c   :  { %4637 = vpow2.f32 %v2750_v21  ;;  %v2743_v27 = vsub.f32 %v2711_v3, %v2731_v22  ;;  %v2742_v28 = vsub.f32 %v2710_v40, %v2728_v25 }
 0xe0e   :  { %v2756_v26 = vmul.f32 1.442695, %v2743_v27  ;;  %v2754_v23 = vmul.f32 1.442695, %v2742_v28 }
 0xe0f   :  { %v2737_v30 = vpop.xlane.xlu1 %2736  ;;  %v2734_v32 = vpop.xlane.xlu0 %2733 }
 0xe10   :  { %4639 = vpow2.f32 %v2756_v26  ;;  %v2745_v34 = vsub.f32 %v2713_v14, %v2737_v30  ;;  %v2744_v36 = vsub.f32 %v2712_v6, %v2734_v32  ;;  %v4094_v30 = vld [vmem:[%s5521_s5 + $0x38] sm:$0xff]  ;;  %v4093_v32 = vld [vmem:[%s5521_s5 + $0x30] sm:$0xff] }
 0xe11   :  { %4641 = vpow2.f32 %v2754_v23 }
 0xe12   :  { %v2760_v38 = vmul.f32 1.442695, %v2745_v34  ;;  %v2758_v45 = vmul.f32 1.442695, %v2744_v36  ;;  %v4092_v34 = vld [vmem:[%s5521_s5 + $0x28] sm:$0xff] }
 0xe13   :  { %v2879_v47 = vpop.permute.xlu1 %2878  ;;  %v2803_v55 = vpop.permute.xlu0 %2802 }
 0xe14   :  { %4643 = vpow2.f32 %v2760_v38  ;;  %4447 = vmatpush3.msra.mxu0 %v2803_v55  ;;  %4452 = vmatpush3.msra.mxu1 %v2879_v47  ;;  %v4091_v38 = vld [vmem:[%s5521_s5 + $0x20] sm:$0xff] }
 0xe15   :  { %v4636_v43 = vpop.eup %4635  ;;  %4645 = vpow2.f32 %v2758_v45  ;;  %4456 = vmatprep.subr.mxu0 %v4675_v35  ;;  %4461 = vmatprep.subr.mxu1 %v4675_v35 }
 0xe16   :  { %v2771_v46 = vsel %vm208_vm2, %v4636_v43, 0.0 }
 0xe17   :  { %2772 = vadd.xlane.f32.xlu1 %v2771_v46  ;;  %v2955_v58 = vpop.permute.xlu1 %2954  ;;  %v3107_v59 = vpop.permute.xlu0 %3106 }
 0xe19   :  { %v4638_v52 = vpop.eup %4637 }
 0xe1a   :  { %v2768_v37 = vsel %vm208_vm2, %v4638_v52, 0.0 }
 0xe1b   :  { %2769 = vadd.xlane.f32.xlu0 %v2768_v37  ;;  %v3031_v60 = vpop.permute.xlu1 %3030 }
 0xe1d   :  { %v4640_v61 = vpop.eup %4639 }
 0xe1e   :  { %v4642_v41 = vpop.eup %4641  ;;  %v2777_v39 = vsel %vm208_vm2, %v4640_v61, 0.0 }
 0xe1f   :  { %2778 = vadd.xlane.f32.xlu1 %v2777_v39  ;;  %v2774_v40 = vsel %vm208_vm2, %v4642_v41, 0.0  ;;  %v3183_v4 = vpop.permute.xlu1 %3182 }
 0xe20   :  { %2775 = vadd.xlane.f32.xlu0 %v2774_v40 }
 0xe21   :  { %v5300_v42 = vpop.eup %4643 }
 0xe22   :  { %v5302_v44 = vpop.eup %4645  ;;  %v2783_v54 = vsel %vm208_vm2, %v5300_v42, 0.0 }
 0xe23   :  { %2784 = vadd.xlane.f32.xlu1 %v2783_v54  ;;  %v2780_v3 = vsel %vm208_vm2, %v5302_v44, 0.0 }
 0xe24   :  { %2781 = vadd.xlane.f32.xlu0 %v2780_v3 }
 0xe34   :  { %3334 = vrot.lane.b32.xlu1 %v5207_v5, %s4681_s1 }
 0xe3a   :  { %3258 = vrot.lane.b32.xlu0 %v5196_v31, %s4681_s1 }
 0xe48   :  { %v2764_v7 = vpop.xlane.xlu0 %2763 }
 0xe49   :  { %4647 = vrcp.f32 %v2764_v7 }
 0xe50   :  { %v2767_v6 = vpop.xlane.xlu1 %2766 }
 0xe51   :  { %4649 = vrcp.f32 %v2767_v6 }
 0xe56   :  { %v4648_v8 = vpop.eup %4647 }
 0xe57   :  { %v2794_v14 = vmul.f32 %v4648_v8, %v5286_v0 }
 0xe59   :  { %4449 = vmatmul.mubr.msk.f32.vlgmr.msra.gmra.mxu0 %vm208_vm2, %v2794_v14  ;;  %v5369_v14 = vld [vmem:[%s5522_s9 + $0x8] sm:$0x3f] }
 0xe5a   :  { %4457 = vmatpush3.msra.mxu0 %v2955_v58  ;;  %4458 = vmatprep.mubr.msk.f32.mxu0 %vm4676_vm1, %v4675_v35 }
 0xe5b   :  { %4466 = vmatprep.subr.mxu0 %v4675_v35 }
 0xe5e   :  { %v4650_v31 = vpop.eup %4649 }
 0xe5f   :  { %v2795_v5 = vmul.f32 %v4650_v31, %v5290_v63  ;;  %v3448_v31 = vrot.slane %v5369_v14, %v1613_v49 }
 0xe61   :  { %4454 = vmatmul.mubr.msk.f32.vlgmr.msra.gmra.mxu1 %vm208_vm2, %v2795_v5 }
 0xe62   :  { %4462 = vmatpush3.msra.mxu1 %v3031_v60  ;;  %4463 = vmatprep.mubr.msk.f32.mxu1 %vm4676_vm1, %v4675_v35 }
 0xe63   :  { %4471 = vmatprep.subr.mxu1 %v4675_v35 }
 0xea0   :  { %v2773_v10 = vpop.xlane.xlu1 %2772 }
 0xea1   :  { %4651 = vrcp.f32 %v2773_v10 }
 0xea4   :  { %v2770_v9 = vpop.xlane.xlu0 %2769 }
 0xea5   :  { %4653 = vrcp.f32 %v2770_v9 }
 0xea8   :  { %v2779_v18 = vpop.xlane.xlu1 %2778 }
 0xea9   :  { %4655 = vrcp.f32 %v2779_v18  ;;  %v2776_v24 = vpop.xlane.xlu0 %2775 }
 0xeaa   :  { %4657 = vrcp.f32 %v2776_v24 }
 0xeac   :  { %v2785_v29 = vpop.xlane.xlu1 %2784 }
 0xead   :  { %4659 = vrcp.f32 %v2785_v29  ;;  %v2782_v11 = vpop.xlane.xlu0 %2781 }
 0xeae   :  { %v4652_v50 = vpop.eup %4651  ;;  %4661 = vrcp.f32 %v2782_v11 }
 0xeaf   :  { %v2797_v15 = vmul.f32 %v4652_v50, %v4636_v43 }
 0xeb0   :  { %v3335_v17 = vpop.permute.xlu1 %3334 }
 0xeb1   :  { %4464 = vmatmul.mubr.msk.f32.vlgmr.msra.gmra.mxu1 %vm208_vm2, %v2797_v15  ;;  %v3259_v20 = vpop.permute.xlu0 %3258 }
 0xeb2   :  { %v4654_v0 = vpop.eup %4653  ;;  %4472 = vmatpush3.msra.mxu1 %v3183_v4  ;;  %4473 = vmatprep.mubr.msk.f32.mxu1 %vm4676_vm1, %v4675_v35 }
 0xeb3   :  { %v2796_v62 = vmul.f32 %v4654_v0, %v4638_v52  ;;  %4481 = vmatprep.subr.mxu1 %v4675_v35 }
 0xeb5   :  { %4459 = vmatmul.mubr.msk.f32.vlgmr.msra.gmra.mxu0 %vm208_vm2, %v2796_v62 }
 0xeb6   :  { %v4656_v63 = vpop.eup %4655  ;;  %4467 = vmatpush3.msra.mxu0 %v3107_v59  ;;  %4468 = vmatprep.mubr.msk.f32.mxu0 %vm4676_vm1, %v4675_v35 }
 0xeb7   :  { %v4658_v33 = vpop.eup %4657  ;;  %4476 = vmatprep.subr.mxu0 %v4675_v35  ;;  %v2799_v2 = vmul.f32 %v4656_v63, %v4640_v61 }
 0xeb8   :  { %v2798_v16 = vmul.f32 %v4658_v33, %v4642_v41 }
 0xeb9   :  { %4474 = vmatmul.mubr.msk.f32.vlgmr.msra.gmra.mxu1 %vm208_vm2, %v2799_v2 }
 0xeba   :  { %v4660_v19 = vpop.eup %4659  ;;  %4469 = vmatmul.mubr.msk.f32.vlgmr.msra.gmra.mxu0 %vm208_vm2, %v2798_v16  ;;  %4482 = vmatpush3.msra.mxu1 %v3335_v17 }
 0xebb   :  { %v4662_v21 = vpop.eup %4661  ;;  %4477 = vmatpush3.msra.mxu0 %v3259_v20  ;;  %4478 = vmatprep.mubr.msk.f32.mxu0 %vm4676_vm1, %v4675_v35  ;;  %v2801_v22 = vmul.f32 %v4660_v19, %v5300_v42  ;;  %v4099_v19 = vld [vmem:[%s5523_s6 + $0x30] sm:$0xff]  ;;  %v4098_v20 = vld [vmem:[%s5523_s6 + $0x28] sm:$0xff] }
 0xebc   :  { %4483 = vmatprep.mubr.msk.f32.mxu1 %vm4676_vm1, %v4675_v35  ;;  %v2800_v25 = vmul.f32 %v4662_v21, %v5302_v44  ;;  %4486 = vmatprep.subr.mxu0 %v4094_v30  ;;  %v4097_v21 = vld [vmem:[%s5523_s6 + $0x20] sm:$0xff] }
 0xebd   :  { %4484 = vmatmul.mubr.msk.f32.vlgmr.msra.gmra.mxu1 %vm208_vm2, %v2801_v22 }
 0xebe   :  { %4479 = vmatmul.mubr.msk.f32.vlgmr.msra.gmra.mxu0 %vm208_vm2, %v2800_v25 }
 0xebf   :  { %4487 = vmatpush3.msra.mxu0 %v4094_v30  ;;  %v3561_v30 = vrot.slane %v5369_v14, %v1726_v13  ;;  %v4112_v13 = vld [vmem:[%s5524_s8 + $0x78] sm:$0xff] }
 0xec0   :  { %4488 = vmatprep.subr.mxu0 %v4093_v32 }
 0xec1   :  { %4489 = vmatpush3.msra.mxu0 %v4093_v32 }
 0xec2   :  { %4490 = vmatprep.subr.mxu0 %v4092_v34 }
 0xec3   :  { %4491 = vmatpush3.msra.mxu0 %v4092_v34  ;;  %v3567_v34 = vrot.slane %v5369_v14, %v1732_v12  ;;  %v4111_v12 = vld [vmem:[%s5524_s8 + $0x70] sm:$0xff] }
 0xec4   :  { %4492 = vmatprep.subr.mxu0 %v4091_v38 }
 0xec5   :  { %4493 = vmatpush3.msra.mxu0 %v4091_v38 }
 0xec6   :  { %4508 = vmatprep.subr.mxu0 %v4112_v13 }
 0xf19   :  { %v2874_v27 = vpop.f32.mrf.mxu0 }
 0xf1b   :  { %v4450_v28 = vpop.f32.mrf.mxu0 }
 0xf21   :  { %v2950_v26 = vpop.f32.mrf.mxu1 }
 0xf23   :  { %v4455_v23 = vpop.f32.mrf.mxu1 }
 0xf71   :  { %v3102_v35 = vpop.f32.mrf.mxu1 }
 0xf72   :  { %3426 = vrot.lane.b32.xlu0 %v3102_v35, %s4682_s22 }
 0xf73   :  { %v4465_v36 = vpop.f32.mrf.mxu1 }
 0xf75   :  { %v3026_v45 = vpop.f32.mrf.mxu0 }
 0xf76   :  { %3411 = vrot.lane.b32.xlu0 %v3026_v45, %s4682_s22 }
 0xf77   :  { %v4460_v47 = vpop.f32.mrf.mxu0 }
 0xf79   :  { %v3254_v55 = vpop.f32.mrf.mxu1 }
 0xf7a   :  { %v3178_v43 = vpop.f32.mrf.mxu0  ;;  %3430 = vrot.lane.b32.xlu0 %v3254_v55, %s4683_s27 }
 0xf7b   :  { %3415 = vrot.lane.b32.xlu1 %v3178_v43, %s4683_s27  ;;  %v4475_v46 = vpop.f32.mrf.mxu1 }
 0xf7c   :  { %v4470_v52 = vpop.f32.mrf.mxu0  ;;  %v4110_v46 = vld [vmem:[%s5524_s8 + $0x68] sm:$0xff] }
 0xf7d   :  { %v3406_v37 = vpop.f32.mrf.mxu1  ;;  %v4109_v52 = vld [vmem:[%s5524_s8 + $0x60] sm:$0xff] }
 0xf7e   :  { %v3330_v61 = vpop.f32.mrf.mxu0 }
 0xf7f   :  { %3419 = vrot.lane.b32.xlu1 %v3330_v61, %s4684_s28  ;;  %v4485_v41 = vpop.f32.mrf.mxu1  ;;  %v4107_v61 = vld [vmem:[%s5524_s8 + $0x50] sm:$0xff] }
 0xf80   :  { %v4480_v39 = vpop.f32.mrf.mxu0  ;;  %v4106_v41 = vld [vmem:[%s5524_s8 + $0x48] sm:$0xff] }
 0xf81   :  { %v4105_v39 = vld [vmem:[%s5524_s8 + $0x40] sm:$0xff] }
 0xf83   :  { %3434 = vrot.lane.b32.xlu1 %v3406_v37, %s4684_s28  ;;  %v4108_v37 = vld [vmem:[%s5524_s8 + $0x58] sm:$0xff] }
 0xfe4   :  { %v3427_v40 = vpop.permute.xlu0 %3426 }
 0xfe5   :  { %v3437_v7 = vsel %vm208_vm2, %v2950_v26, %v3427_v40  ;;  %v4102_v40 = vld [vmem:[%s5525_s7 + $0x1] ss:$0 sm:$0xff] }
 0xfe8   :  { %v3412_v42 = vpop.permute.xlu0 %3411 }
 0xfe9   :  { %v3422_v54 = vsel %vm208_vm2, %v2874_v27, %v3412_v42 }
 0xfec   :  { %v3431_v59 = vpop.permute.xlu0 %3430 }
 0xfed   :  { %v3416_v44 = vpop.permute.xlu1 %3415  ;;  %v3438_v4 = vsel %vm1588_vm3, %v3437_v7, %v3431_v59 }
 0xfee   :  { %v3423_v3 = vsel %vm1588_vm3, %v3422_v54, %v3416_v44 }
 0xff1   :  { %v3420_v58 = vpop.permute.xlu1 %3419 }
 0xff2   :  { %v3424_v60 = vsel %vm1590_vm4, %v3423_v3, %v3420_v58 }
 0xff3   :  { %4494 = vmatprep.mubr.msk.f32.mxu0 %vm51_vm0, %v3424_v60 }
 0xff5   :  { %v3435_v6 = vpop.permute.xlu1 %3434 }
 0xff6   :  { %v3439_v8 = vsel %vm1590_vm4, %v3438_v4, %v3435_v6 }
 0xff7   :  { %4495 = vmatmul.mubr.msk.f32.vlgmr.msra.gmra.mxu0 %vm51_vm0, %v3439_v8 }
 0xff8   :  { %4509 = vmatpush3.msra.mxu0 %v4112_v13 }
 0xff9   :  { %4510 = vmatprep.subr.mxu0 %v4111_v12 }
 0xffa   :  { %4511 = vmatpush3.msra.mxu0 %v4111_v12 }
 0xffb   :  { %4512 = vmatprep.subr.mxu0 %v4110_v46 }
 0xffc   :  { %4513 = vmatpush3.msra.mxu0 %v4110_v46  ;;  %v3807_v46 = vrot.slane %v5369_v14, %v1970_v51  ;;  %v3923_v51 = vld [vmem:[%s5527_s12 + $0x68] sm:$0xff] }
 0xffd   :  { %4514 = vmatprep.subr.mxu0 %v4109_v52 }
 0xffe   :  { %4515 = vmatpush3.msra.mxu0 %v4109_v52 }
 0xfff   :  { %4516 = vmatprep.subr.mxu0 %v4108_v37 }
0x1000   :  { %4517 = vmatpush3.msra.mxu0 %v4108_v37 }
0x1001   :  { %4518 = vmatprep.subr.mxu0 %v4107_v61 }
0x1002   :  { %4519 = vmatpush3.msra.mxu0 %v4107_v61 }
0x1003   :  { %4520 = vmatprep.subr.mxu0 %v4106_v41 }
0x1004   :  { %4521 = vmatpush3.msra.mxu0 %v4106_v41 }
0x1005   :  { %4522 = vmatprep.subr.mxu0 %v4105_v39 }
0x1006   :  { %4523 = vmatpush3.msra.mxu0 %v4105_v39  ;;  %v3813_v39 = vrot.slane %v5369_v14, %v1976_v53  ;;  %v3921_v53 = vld [vmem:[%s5527_s12 + $0x58] sm:$0xff] }
0x10b7   :  { %v4496_v5 = vpop.f32.mrf.mxu0 }
0x10b8   :  { %v3527_v10 = vadd.f32 %v4496_v5, %v3448_v31 }
0x10b9   :  { %v3521_v9 = vpop.f32.mrf.mxu0 }
0x10ba   :  { %v3531_v18 = vadd.f32 %v3527_v10, %v5155_v57  ;;  %v3522_v24 = vadd.f32 %v3521_v9, %v3448_v31 }
0x10bc   :  { %v3530_v29 = vadd.f32 %v3522_v24, %v5153_v56  ;;  %v3535_v11 = vsel %vm51_vm0, %v3531_v18, 0.0  ;;  %v4100_v56 = vld [vmem:[%s5523_s6 + $0x38] sm:$0xff] }
0x10bd   :  { %3536 = vadd.xlane.f32.xlu1 %v3535_v11  ;;  %4497 = vmatprep.subr.mxu1 %v4100_v56 }
0x10be   :  { %v3532_v50 = vsel %vm51_vm0, %v3530_v29, 0.0  ;;  %4498 = vmatpush3.msra.mxu1 %v4100_v56 }
0x10bf   :  { %3533 = vadd.xlane.f32.xlu0 %v3532_v50  ;;  %4499 = vmatprep.subr.mxu1 %v4099_v19 }
0x10c0   :  { %4500 = vmatpush3.msra.mxu1 %v4099_v19 }
0x10c1   :  { %4501 = vmatprep.subr.mxu1 %v4098_v20 }
0x10c2   :  { %4502 = vmatpush3.msra.mxu1 %v4098_v20 }
0x10c3   :  { %4503 = vmatprep.subr.mxu1 %v4097_v21 }
0x10c4   :  { %4504 = vmatpush3.msra.mxu1 %v4097_v21 }
0x1146   :  { %v3537_v15 = vpop.xlane.xlu1 %3536 }
0x1147   :  { %v3539_v0 = vmul.f32 0.03125, %v3537_v15 }
0x1148   :  { %v3534_v62 = vpop.xlane.xlu0 %3533 }
0x1149   :  { %v3538_v63 = vmul.f32 0.03125, %v3534_v62  ;;  %v3541_v33 = vsub.f32 %v3531_v18, %v3539_v0  ;;  %v3694_v62 = vrot.slane %v5369_v14, %v1856_v1  ;;  %v3920_v14 = vld [vmem:[%s5527_s12 + $0x50] sm:$0xff] }
0x114b   :  { %v3540_v49 = vsub.f32 %v3530_v29, %v3538_v63  ;;  %v3543_v17 = vmul.f32 %v3541_v33, %v3541_v33 }
0x114d   :  { %v3542_v2 = vmul.f32 %v3540_v49, %v3540_v49  ;;  %v3547_v57 = vsel %vm51_vm0, %v3543_v17, 0.0 }
0x114f   :  { %v3544_v16 = vsel %vm51_vm0, %v3542_v2, 0.0 }
0x1150   :  { %3545 = vadd.xlane.f32.xlu0 %v3544_v16 }
0x1154   :  { %3548 = vadd.xlane.f32.xlu0 %v3547_v57 }
0x11d9   :  { %v3546_v22 = vpop.xlane.xlu0 %3545 }
0x11da   :  { %v3550_v25 = vmul.f32 0.03125, %v3546_v22 }
0x11dc   :  { %v3552_v27 = vadd.f32 1e-05, %v3550_v25 }
0x11dd   :  { %v3549_v28 = vpop.xlane.xlu0 %3548 }
0x11de   :  { %4663 = vrsqrt.f32 %v3552_v27  ;;  %v3551_v26 = vmul.f32 0.03125, %v3549_v28 }
0x11e0   :  { %v3553_v23 = vadd.f32 1e-05, %v3551_v26 }
0x11e2   :  { %4665 = vrsqrt.f32 %v3553_v23 }
0x11eb   :  { %v4664_v32 = vpop.eup %4663 }
0x11ec   :  { %v3556_v35 = vmul.f32 %v4664_v32, %v3540_v49  ;;  %v3818_v32 = vld [vmem:[%s5526_s10 + $0x10] sm:$0xff] }
0x11ee   :  { %v3562_v36 = vmul.f32 %v3561_v30, %v3556_v35  ;;  %v3817_v35 = vld [vmem:[%s5526_s10 + $0x8] sm:$0xff] }
0x11ef   :  { %v4666_v38 = vpop.eup %4665 }
0x11f0   :  { %v3557_v45 = vmul.f32 %v4666_v38, %v3541_v33  ;;  %v3568_v47 = vadd.f32 %v3567_v34, %v3562_v36  ;;  %v3925_v36 = vld [vmem:[%s5527_s12 + $0x78] sm:$0xff] }
0x11f2   :  { %v3563_v55 = vmul.f32 %v3561_v30, %v3557_v45  ;;  %4505 = vmatprep.mubr.msk.f32.mxu1 %vm51_vm0, %v3568_v47  ;;  %v3819_v30 = vld [vmem:[%s5526_s10 + $0x18] sm:$0xff] }
0x11f3   :  { %4527 = vmatprep.subr.mxu1 %v3819_v30 }
0x11f4   :  { %v3569_v43 = vadd.f32 %v3567_v34, %v3563_v55  ;;  %v3816_v34 = vld [vmem:[%s5526_s10] sm:$0xff] }
0x11f6   :  { %4506 = vmatmul.mubr.msk.f32.vlgmr.msra.gmra.mxu1 %vm51_vm0, %v3569_v43 }
0x11f7   :  { %4528 = vmatpush3.msra.mxu1 %v3819_v30 }
0x11f8   :  { %4529 = vmatprep.subr.mxu1 %v3818_v32 }
0x11f9   :  { %4530 = vmatpush3.msra.mxu1 %v3818_v32 }
0x11fa   :  { %4531 = vmatprep.subr.mxu1 %v3817_v35 }
0x11fb   :  { %4532 = vmatpush3.msra.mxu1 %v3817_v35 }
0x11fc   :  { %4533 = vmatprep.subr.mxu1 %v3816_v34 }
0x11fd   :  { %4534 = vmatpush3.msra.mxu1 %v3816_v34 }
0x11fe   :  { %4538 = vmatprep.subr.mxu1 %v3925_v36 }
0x12b6   :  { %v4507_v42 = vpop.f32.mrf.mxu1 }
0x12b7   :  { %v3661_v44 = vadd.f32 %v4507_v42, %v4102_v40 }
0x12b8   :  { %v3655_v54 = vpop.f32.mrf.mxu1 }
0x12b9   :  { %v3665_v3 = vmul.f32 %v3661_v44, %v3661_v44  ;;  %v3656_v58 = vadd.f32 %v4102_v40, %v3655_v54  ;;  %v3924_v54 = vld [vmem:[%s5527_s12 + $0x70] sm:$0xff] }
0x12bb   :  { %v3667_v59 = vmul.f32 %v3665_v3, %v3661_v44  ;;  %v3664_v60 = vmul.f32 %v3656_v58, %v3656_v58  ;;  %v3919_v3 = vld [vmem:[%s5527_s12 + $0x48] sm:$0xff] }
0x12bd   :  { %v3669_v7 = vmul.f32 0.044715, %v3667_v59  ;;  %v3666_v4 = vmul.f32 %v3664_v60, %v3656_v58  ;;  %v3917_v59 = vld [vmem:[%s5527_s12 + $0x38] sm:$0xff]  ;;  %v3916_v60 = vld [vmem:[%s5527_s12 + $0x30] sm:$0xff] }
0x12bf   :  { %v3671_v6 = vadd.f32 %v3669_v7, %v3661_v44  ;;  %v3668_v8 = vmul.f32 0.044715, %v3666_v4  ;;  %v3915_v7 = vld [vmem:[%s5527_s12 + $0x28] sm:$0xff]  ;;  %v3914_v4 = vld [vmem:[%s5527_s12 + $0x20] sm:$0xff] }
0x12c1   :  { %v3673_v31 = vmul.f32 0.7978846, %v3671_v6  ;;  %v3670_v5 = vadd.f32 %v3668_v8, %v3656_v58  ;;  %v3913_v6 = vld [vmem:[%s5527_s12 + $0x18] sm:$0xff]  ;;  %v3912_v8 = vld [vmem:[%s5527_s12 + $0x10] sm:$0xff] }
0x12c3   :  { %4667 = vtanh.f32 %v3673_v31  ;;  %v3672_v10 = vmul.f32 0.7978846, %v3670_v5  ;;  %v3911_v31 = vld [vmem:[%s5527_s12 + $0x8] sm:$0xff]  ;;  %v3910_v5 = vld [vmem:[%s5527_s12] sm:$0xff] }
0x12c5   :  { %4669 = vtanh.f32 %v3672_v10  ;;  %v4115_v10 = vld [vmem:[%s5528_s11] ss:$0 sm:$0xff] }
0x12d0   :  { %v4668_v9 = vpop.eup %4667 }
0x12d1   :  { %v3677_v18 = vadd.f32 1.0, %v4668_v9 }
0x12d2   :  { %v4670_v24 = vpop.eup %4669 }
0x12d3   :  { %v3676_v29 = vadd.f32 1.0, %v4670_v24  ;;  %v3679_v11 = vmul.f32 0.5, %v3677_v18 }
0x12d5   :  { %v3678_v50 = vmul.f32 0.5, %v3676_v29  ;;  %v3681_v0 = vmul.f32 %v3679_v11, %v3661_v44 }
0x12d7   :  { %v3680_v15 = vmul.f32 %v3678_v50, %v3656_v58  ;;  %v3918_v58 = vld [vmem:[%s5527_s12 + $0x40] sm:$0xff] }
0x12d9   :  { %4524 = vmatprep.mubr.msk.f32.mxu0 %vm1858_vm5, %v3680_v15  ;;  %v4118_v15 = vld [vmem:[%s5529_s13] ss:$0 sm:$0xff] }
0x12da   :  { %4525 = vmatmul.mubr.msk.f32.vlgmr.msra.gmra.mxu0 %vm1858_vm5, %v3681_v0 }
0x139a   :  { %v4526_v63 = vpop.f32.mrf.mxu0 }
0x139b   :  { %v3773_v33 = vadd.f32 %v4526_v63, %v3694_v62 }
0x139c   :  { %v3767_v49 = vpop.f32.mrf.mxu0 }
0x139d   :  { %v3777_v2 = vadd.f32 %v3773_v33, %v3569_v43  ;;  %v3768_v16 = vadd.f32 %v3767_v49, %v3694_v62 }
0x139f   :  { %v3776_v17 = vadd.f32 %v3768_v16, %v3568_v47  ;;  %v3781_v57 = vsel %vm51_vm0, %v3777_v2, 0.0 }
0x13a0   :  { %3782 = vadd.xlane.f32.xlu1 %v3781_v57 }
0x13a1   :  { %v3778_v56 = vsel %vm51_vm0, %v3776_v17, 0.0 }
0x13a2   :  { %3779 = vadd.xlane.f32.xlu0 %v3778_v56 }
0x1429   :  { %v3783_v19 = vpop.xlane.xlu1 %3782 }
0x142a   :  { %v3785_v20 = vmul.f32 0.03125, %v3783_v19 }
0x142b   :  { %v3780_v21 = vpop.xlane.xlu0 %3779 }
0x142c   :  { %v3787_v22 = vsub.f32 %v3777_v2, %v3785_v20  ;;  %v3784_v25 = vmul.f32 0.03125, %v3780_v21 }
0x142e   :  { %v3786_v27 = vsub.f32 %v3776_v17, %v3784_v25  ;;  %v3789_v28 = vmul.f32 %v3787_v22, %v3787_v22 }
0x1430   :  { %v3793_v1 = vsel %vm51_vm0, %v3789_v28, 0.0  ;;  %v3788_v26 = vmul.f32 %v3786_v27, %v3786_v27 }
0x1431   :  { %3794 = vadd.xlane.f32.xlu1 %v3793_v1 }
0x1432   :  { %v3790_v23 = vsel %vm51_vm0, %v3788_v26, 0.0 }
0x1433   :  { %3791 = vadd.xlane.f32.xlu0 %v3790_v23 }
0x14ba   :  { %v3795_v38 = vpop.xlane.xlu1 %3794 }
0x14bb   :  { %v3797_v45 = vmul.f32 0.03125, %v3795_v38 }
0x14bc   :  { %v3792_v47 = vpop.xlane.xlu0 %3791 }
0x14bd   :  { %v3799_v55 = vadd.f32 1e-05, %v3797_v45  ;;  %v3796_v43 = vmul.f32 0.03125, %v3792_v47 }
0x14bf   :  { %4671 = vrsqrt.f32 %v3799_v55  ;;  %v3798_v13 = vadd.f32 1e-05, %v3796_v43 }
0x14c1   :  { %4673 = vrsqrt.f32 %v3798_v13 }
0x14cc   :  { %v4672_v12 = vpop.eup %4671 }
0x14cd   :  { %v3803_v52 = vmul.f32 %v4672_v12, %v3787_v22 }
0x14ce   :  { %v4674_v37 = vpop.eup %4673 }
0x14cf   :  { %v3802_v61 = vmul.f32 %v4674_v37, %v3786_v27  ;;  %v3809_v41 = vmul.f32 %v3807_v46, %v3803_v52 }
0x14d1   :  { %v3808_v40 = vmul.f32 %v3807_v46, %v3802_v61  ;;  %v3815_v44 = vadd.f32 %v3813_v39, %v3809_v41 }
0x14d3   :  { %v3814_v42 = vadd.f32 %v3813_v39, %v3808_v40 }
0x14d5   :  { %4535 = vmatprep.mubr.msk.f32.mxu1 %vm51_vm0, %v3814_v42 }
0x14d6   :  { %4536 = vmatmul.mubr.msk.f32.vlgmr.msra.gmra.mxu1 %vm51_vm0, %v3815_v44 }
0x14d7   :  { %4539 = vmatpush3.msra.mxu1 %v3925_v36 }
0x14d8   :  { %4540 = vmatprep.subr.mxu1 %v3924_v54 }
0x14d9   :  { %4541 = vmatpush3.msra.mxu1 %v3924_v54 }
0x14da   :  { %4542 = vmatprep.subr.mxu1 %v3923_v51 }
0x14db   :  { %4543 = vmatpush3.msra.mxu1 %v3923_v51 }
0x14dc   :  { %4544 = vmatprep.subr.mxu1 %v3922_v48 }
0x14dd   :  { %4545 = vmatpush3.msra.mxu1 %v3922_v48 }
0x14de   :  { %4546 = vmatprep.subr.mxu1 %v3921_v53 }
0x14df   :  { %4547 = vmatpush3.msra.mxu1 %v3921_v53 }
0x14e0   :  { %4548 = vmatprep.subr.mxu1 %v3920_v14 }
0x14e1   :  { %4549 = vmatpush3.msra.mxu1 %v3920_v14 }
0x14e2   :  { %4550 = vmatprep.subr.mxu1 %v3919_v3 }
0x14e3   :  { %4551 = vmatpush3.msra.mxu1 %v3919_v3 }
0x14e4   :  { %4552 = vmatprep.subr.mxu1 %v3918_v58 }
0x14e5   :  { %4553 = vmatpush3.msra.mxu1 %v3918_v58 }
0x14e6   :  { %4554 = vmatprep.subr.mxu1 %v3917_v59 }
0x14e7   :  { %4555 = vmatpush3.msra.mxu1 %v3917_v59 }
0x14e8   :  { %4556 = vmatprep.subr.mxu1 %v3916_v60 }
0x14e9   :  { %4557 = vmatpush3.msra.mxu1 %v3916_v60 }
0x14ea   :  { %4558 = vmatprep.subr.mxu1 %v3915_v7 }
0x14eb   :  { %4559 = vmatpush3.msra.mxu1 %v3915_v7 }
0x14ec   :  { %4560 = vmatprep.subr.mxu1 %v3914_v4 }
0x14ed   :  { %4561 = vmatpush3.msra.mxu1 %v3914_v4 }
0x14ee   :  { %4562 = vmatprep.subr.mxu1 %v3913_v6 }
0x14ef   :  { %4563 = vmatpush3.msra.mxu1 %v3913_v6 }
0x14f0   :  { %4564 = vmatprep.subr.mxu1 %v3912_v8 }
0x14f1   :  { %4565 = vmatpush3.msra.mxu1 %v3912_v8 }
0x14f2   :  { %4566 = vmatprep.subr.mxu1 %v3911_v31 }
0x14f3   :  { %4567 = vmatpush3.msra.mxu1 %v3911_v31 }
0x14f4   :  { %4568 = vmatprep.subr.mxu1 %v3910_v5 }
0x14f5   :  { %4569 = vmatpush3.msra.mxu1 %v3910_v5 }
0x1596   :  { %v4537_v9 = vpop.f32.mrf.mxu1 }
0x1597   :  { %v3905_v18 = vadd.f32 %v4537_v9, %v4115_v10 }
0x1598   :  { %v3899_v24 = vpop.f32.mrf.mxu1 }
0x1599   :  { %v3900_v29 = vadd.f32 %v4115_v10, %v3899_v24  ;;  %v3909_v50 = vmax.f32 %v3905_v18, 0.0 }
0x159b   :  { %v3908_v11 = vmax.f32 %v3900_v29, 0.0 }
0x159d   :  { %4570 = vmatprep.mubr.f32.mxu1 %v3908_v11 }
0x159e   :  { %4571 = vmatmul.mubr.f32.vlgmr.msra.gmra.mxu1 %v3909_v50 }
0x165e   :  { %v4572_v0 = vpop.f32.mrf.mxu1 }
0x165f   :  { %v4005_v62 = vadd.f32 %v4572_v0, %v4118_v15 }
0x1660   :  { %v3999_v63 = vpop.f32.mrf.mxu1 }
0x1661   :  { %4009 = vst [vmem:[%s5530_s14 + $0x8] sm:$0xff] %v4005_v62  ;;  %v4000_v33 = vadd.f32 %v4118_v15, %v3999_v63 }
0x1663   :  { %4008 = vst [vmem:[%s5530_s14] sm:$0xff] %v4000_v33 }

</bundles_post_ra>
